<compile_context>
chip_gen: v5e
topology: v5e:2x2
jax: 0.10.0
libtpu: 0.0.40
codegen_flags: <defaults>
</compile_context>

<pallas_src>
import functools

import jax
import jax.numpy as jnp
from jax.experimental import pallas as pl
from jax.experimental.pallas import tpu as pltpu


def _pick_row_block(Ho, Wo, max_lanes=2048):
    """Largest divisor TR of Ho with TR*Wo a multiple of 128 (lane-dense) under
    the lane cap; falls back to the smallest lane-dense divisor, then to Ho."""
    lane_dense = [tr for tr in range(1, Ho + 1)
                  if Ho % tr == 0 and (tr * Wo) % 128 == 0]
    if not lane_dense:
        # TODO(synk): pad Wo up to a lane-dense width instead of accepting
        # masked (non-128-multiple) stores on this fallback path.
        return Ho
    under = [tr for tr in lane_dense if tr * Wo <= max_lanes]
    return max(under) if under else min(lane_dense)


def _pick_lane_block(total, max_lanes=32768):
    """Largest multiple-of-128 divisor of `total` under the cap (else `total`)."""
    best = None
    for d in range(128, min(total, max_lanes) + 1, 128):
        if total % d == 0:
            best = d
    return best if best is not None else total


def _conv_stats_kernel(x_ref, w_ref, o_ref, stats_ref, p_ref, *,
                       KH, KW, stride, TR, Wo, compute_dtype):
    """Pass 1: one transposed im2col matmul per tile + accumulated BN partials.

    x_ref:     (1, Cin, 1, n_rows, Wp)  source dtype; pre-padded row window (halo incl.)
    w_ref:     (Cout, KH*KW*Cin)        compute_dtype, rows ordered (kh, kw, cin)
    o_ref:     (1, Cout, TR*Wo)         compute_dtype, lane-dense conv tile (NCHW order)
    stats_ref: (1, Cout, 2)             f32 [sum, sum_sq]; resident across r
    p_ref:     (KH*KW*Cin, TR*Wo)       compute_dtype VMEM scratch (im2col patches)
    """
    r = pl.program_id(1)
    Cin = x_ref.shape[1]
    n_rows, Wp = x_ref.shape[3], x_ref.shape[4]
    L = TR * Wo

    # Squeeze unit dims (free, no lane/sublane relayout) and cast once.
    xb = x_ref[...].reshape(Cin, n_rows, Wp).astype(compute_dtype)

    # Transposed im2col written straight into VMEM scratch at static offsets:
    # p_ref[(kh*KW + kw)*Cin + c, oh*Wo + ow] = x[c, oh*s + kh, ow*s + kw]
    for kh in range(KH):
        for kw in range(KW):
            s = jax.lax.slice(
                xb, (0, kh, kw),
                (Cin, kh + (TR - 1) * stride + 1, kw + (Wo - 1) * stride + 1),
                (1, stride, stride))                          # (Cin, TR, Wo)
            p_ref[pl.ds((kh * KW + kw) * Cin, Cin), :] = s.reshape(Cin, L)

    # Single MXU matmul with K = KH*KW*Cin; result is lane-dense (Cout, L), f32 acc.
    o = jax.lax.dot_general(
        w_ref[...], p_ref[...], (((1,), (0,)), ((), ())),
        preferred_element_type=jnp.float32)

    o_ref[0] = o.astype(o_ref.dtype)

    # One-pass BN statistics from the f32 accumulator; accumulate in the
    # resident output block across the (arbitrary) r axis.
    s1 = jnp.sum(o, axis=1, keepdims=True)                    # (Cout, 1)
    s2 = jnp.sum(o * o, axis=1, keepdims=True)                # (Cout, 1)

    @pl.when(r == 0)
    def _():
        stats_ref[...] = jnp.zeros_like(stats_ref)

    stats_ref[0] += jnp.concatenate([s1, s2], axis=1)         # (Cout, 2)


def _bn_relu_kernel(y_ref, ss_ref, o_ref, *, relu):
    """Pass 2: y * scale + shift (+ ReLU); f32 math, lane-dense loads/stores."""
    y = y_ref[0].astype(jnp.float32)                          # (Cout, L2)
    z = y * ss_ref[:, 0:1] + ss_ref[:, 1:2]
    if relu:
        z = jnp.maximum(z, 0.0)
    o_ref[0] = z.astype(o_ref.dtype)


def basic_conv(x_nchw, weight_oihw, gamma, beta, *, stride=1, padding=1,
               eps=1e-5, relu=True, compute_dtype=jnp.bfloat16):
    """BasicConv forward. x: (N, Cin, H, W) NCHW; weight: (Cout, Cin, KH, KW)."""
    N, Cin, H, W = x_nchw.shape
    Cout, _, KH, KW = weight_oihw.shape
    Hp, Wp = H + 2 * padding, W + 2 * padding
    Ho = (Hp - KH) // stride + 1
    Wo = (Wp - KW) // stride + 1
    K = KH * KW * Cin

    # Weight as (Cout, K), rows ordered (kh, kw, cin); tiny one-time cast.
    w2 = (jnp.transpose(weight_oihw, (0, 2, 3, 1))
          .reshape(Cout, K).astype(compute_dtype))

    TR = _pick_row_block(Ho, Wo)
    n_hblk = Ho // TR
    L = TR * Wo
    n_rows = (TR - 1) * stride + KH

    # One-time zero pad in HBM (keeps the source dtype — no f32 upcast).
    xp = jnp.pad(x_nchw, ((0, 0), (0, 0), (padding, padding), (padding, padding)))

    # Halo-replicated row-window view (N, Cin, n_hblk, n_rows, Wp): each grid
    # step DMAs only its own row window (halo included) via the auto-pipeline.
    if n_hblk == 1:
        x_win = xp[:, :, :n_rows, :].reshape(N, Cin, 1, n_rows, Wp)
    else:
        rows = (jnp.arange(n_hblk)[:, None] * (TR * stride)
                + jnp.arange(n_rows)[None, :]).reshape(-1)
        x_win = jnp.take(xp, rows, axis=2).reshape(N, Cin, n_hblk, n_rows, Wp)

    cparams1 = pltpu.CompilerParams(
        dimension_semantics=("parallel", "arbitrary"),
        vmem_limit_bytes=32 * 1024 * 1024)

    conv_flat, stats = pl.pallas_call(
        functools.partial(_conv_stats_kernel, KH=KH, KW=KW, stride=stride,
                          TR=TR, Wo=Wo, compute_dtype=compute_dtype),
        grid=(N, n_hblk),
        in_specs=[
            pl.BlockSpec((1, Cin, 1, n_rows, Wp), lambda n, r: (n, 0, r, 0, 0)),
            pl.BlockSpec((Cout, K), lambda n, r: (0, 0)),
        ],
        out_specs=[
            pl.BlockSpec((1, Cout, L), lambda n, r: (n, 0, r)),
            pl.BlockSpec((1, Cout, 2), lambda n, r: (n, 0, 0)),
        ],
        out_shape=[
            jax.ShapeDtypeStruct((N, Cout, Ho * Wo), compute_dtype),
            jax.ShapeDtypeStruct((N, Cout, 2), jnp.float32),
        ],
        scratch_shapes=[pltpu.VMEM((K, L), compute_dtype)],
        compiler_params=cparams1,
    )(x_win, w2)

    # Fold accumulated partials into batch-stat BN scale/shift (O(Cout), trivial).
    totals = jnp.sum(stats, axis=0)                           # (Cout, 2)
    cnt = float(N * Ho * Wo)
    mean = totals[:, 0] / cnt
    var = jnp.maximum(totals[:, 1] / cnt - mean * mean, 0.0)  # clamp (cancellation)
    inv_std = jax.lax.rsqrt(var + eps)
    scale = gamma.astype(jnp.float32) * inv_std
    shift = beta.astype(jnp.float32) - mean * scale
    ss = jnp.stack([scale, shift], axis=1)                    # (Cout, 2) f32

    # Pass 2: mem-bound BN + ReLU sweep with large lane-dense blocks.
    L2 = _pick_lane_block(Ho * Wo)
    cparams2 = pltpu.CompilerParams(
        dimension_semantics=("parallel", "parallel"),
        vmem_limit_bytes=32 * 1024 * 1024)

    out_flat = pl.pallas_call(
        functools.partial(_bn_relu_kernel, relu=relu),
        grid=(N, (Ho * Wo) // L2),
        in_specs=[
            pl.BlockSpec((1, Cout, L2), lambda n, j: (n, 0, j)),
            pl.BlockSpec((Cout, 2), lambda n, j: (0, 0)),
        ],
        out_specs=pl.BlockSpec((1, Cout, L2), lambda n, j: (n, 0, j)),
        out_shape=jax.ShapeDtypeStruct((N, Cout, Ho * Wo), x_nchw.dtype),
        compiler_params=cparams2,
    )(conv_flat, ss)

    return out_flat.reshape(N, Cout, Ho, Wo)                  # already NCHW


def _reference(x_nchw, weight_oihw, gamma, beta, *, stride=1, padding=1,
               eps=1e-5, relu=True):
    """Pure-JAX reference: conv (NCHW) + batch-stat BN + optional ReLU."""
    y = jax.lax.conv_general_dilated(
        x_nchw.astype(jnp.float32),
        weight_oihw.astype(jnp.float32),
        window_strides=(stride, stride),
        padding=[(padding, padding), (padding, padding)],
        dimension_numbers=("NCHW", "OIHW", "NCHW"),
    )
    mean = jnp.mean(y, axis=(0, 2, 3), keepdims=True)
    var = jnp.mean((y - mean) ** 2, axis=(0, 2, 3), keepdims=True)
    y = (y - mean) * jax.lax.rsqrt(var + eps)
    y = y * gamma.reshape(1, -1, 1, 1) + beta.reshape(1, -1, 1, 1)
    return jnp.maximum(y, 0.0) if relu else y


if __name__ == "__main__":
    key = jax.random.PRNGKey(0)
    k1, k2, k3, k4 = jax.random.split(key, 4)

    # Config A: BasicConv(in=4, out=8, kernel_size=3, stride=1, padding=1).
    N, Cin, H, W = 2, 4, 16, 16
    Cout, KH, KW = 8, 3, 3
    x = jax.random.normal(k1, (N, Cin, H, W), dtype=jnp.float32)
    weight = 0.1 * jax.random.normal(k2, (Cout, Cin, KH, KW), dtype=jnp.float32)
    gamma = jnp.ones((Cout,), jnp.float32)   # BatchNorm2d affine init
    beta = jnp.zeros((Cout,), jnp.float32)

    ref = _reference(x, weight, gamma, beta, stride=1, padding=1, relu=True)

    # Exactness check: f32 matmul operands + f32 intermediate match the reference.
    out_f32 = jax.block_until_ready(
        basic_conv(x, weight, gamma, beta, stride=1, padding=1, relu=True,
                   compute_dtype=jnp.float32))
    assert out_f32.shape == (N, Cout, H, W), out_f32.shape
    assert jnp.allclose(out_f32, ref, atol=1e-4, rtol=1e-4), \
        float(jnp.abs(out_f32 - ref).max())

    # Fast path: bf16 matmul operands + bf16 intermediate, f32 accumulation/BN.
    out_bf16 = jax.block_until_ready(
        basic_conv(x, weight, gamma, beta, stride=1, padding=1, relu=True,
                   compute_dtype=jnp.bfloat16))
    assert out_bf16.shape == (N, Cout, H, W), out_bf16.shape
    assert jnp.allclose(out_bf16, ref, atol=1e-1, rtol=1e-1), \
        float(jnp.abs(out_bf16 - ref).max())

    # Config B: the actual GLAMOR_v3 SpatialGate conv —
    # BasicConv(2, 1, kernel_size=7, stride=1, padding=3, relu=False).
    xs = jax.random.normal(k3, (N, 2, H, W), dtype=jnp.float32)
    ws = 0.1 * jax.random.normal(k4, (1, 2, 7, 7), dtype=jnp.float32)
    gs = jnp.ones((1,), jnp.float32)
    bs = jnp.zeros((1,), jnp.float32)
    ref_s = _reference(xs, ws, gs, bs, stride=1, padding=3, relu=False)
    out_s = jax.block_until_ready(
        basic_conv(xs, ws, gs, bs, stride=1, padding=3, relu=False,
                   compute_dtype=jnp.float32))
    assert out_s.shape == (N, 1, H, W), out_s.shape
    assert jnp.allclose(out_s, ref_s, atol=1e-4, rtol=1e-4), \
        float(jnp.abs(out_s - ref_s).max())

    print("KERNEL_OK")
</pallas_src>

<mosaic_0001>
module attributes {stable_mosaic.version = 11 : i64} {
  func.func @_conv_stats_kernel(%arg0: i32, %arg1: i32, %arg2: memref<1x4x1x18x18xf32, #tpu.memory_space<vmem>>, %arg3: memref<8x36xf32, #tpu.memory_space<vmem>>, %arg4: memref<1x8x256xf32, #tpu.memory_space<vmem>>, %arg5: memref<1x8x2xf32, #tpu.memory_space<vmem>>, %arg6: memref<36x256xf32, #tpu.memory_space<vmem>>) attributes {dimension_semantics = [#tpu.dimension_semantics<parallel>, #tpu.dimension_semantics<arbitrary>], iteration_bounds = array<i64: 2, 1>, scalar_prefetch = 0 : i64, scratch_operands = 1 : i64, tpu.core_type = #tpu.core_type<tc>, window_params = [{transform_indices = @transform_0, window_bounds = array<i64: 1, 4, 1, 18, 18>}, {pipeline_mode = #tpu.pipeline_mode<synchronous>, transform_indices = @transform_1, window_bounds = array<i64: 8, 36>}, {transform_indices = @transform_2, window_bounds = array<i64: 1, 8, 256>}, {transform_indices = @transform_3, window_bounds = array<i64: 1, 8, 2>}]} {
    %c0 = arith.constant 0 : index
    %c0_0 = arith.constant 0 : index
    %c0_1 = arith.constant 0 : index
    %c0_2 = arith.constant 0 : index
    %c0_3 = arith.constant 0 : index
    %0 = vector.load %arg2[%c0, %c0_0, %c0_1, %c0_2, %c0_3] : memref<1x4x1x18x18xf32, #tpu.memory_space<vmem>>, vector<1x4x1x18x18xf32>
    %1 = vector.shape_cast %0 : vector<1x4x1x18x18xf32> to vector<4x18x18xf32>
    %2 = vector.extract_strided_slice %1 {offsets = [0, 0, 0], sizes = [4, 16, 16], strides = [1, 1, 1]} : vector<4x18x18xf32> to vector<4x16x16xf32>
    %3 = vector.shape_cast %2 : vector<4x16x16xf32> to vector<4x256xf32>
    %c0_4 = arith.constant 0 : index
    %c0_5 = arith.constant 0 : index
    %4 = vector.load %arg6[%c0_4, %c0_5] : memref<36x256xf32, #tpu.memory_space<vmem>>, vector<4x256xf32>
    tpu.vector_store %arg6[%c0_4, %c0_5], %3 {strides = array<i32>} : memref<36x256xf32, #tpu.memory_space<vmem>>, vector<4x256xf32>,
    %5 = vector.extract_strided_slice %1 {offsets = [0, 0, 1], sizes = [4, 16, 16], strides = [1, 1, 1]} : vector<4x18x18xf32> to vector<4x16x16xf32>
    %6 = vector.shape_cast %5 : vector<4x16x16xf32> to vector<4x256xf32>
    %c4 = arith.constant 4 : index
    %c0_6 = arith.constant 0 : index
    %7 = vector.load %arg6[%c4, %c0_6] : memref<36x256xf32, #tpu.memory_space<vmem>>, vector<4x256xf32>
    tpu.vector_store %arg6[%c4, %c0_6], %6 {strides = array<i32>} : memref<36x256xf32, #tpu.memory_space<vmem>>, vector<4x256xf32>,
    %8 = vector.extract_strided_slice %1 {offsets = [0, 0, 2], sizes = [4, 16, 16], strides = [1, 1, 1]} : vector<4x18x18xf32> to vector<4x16x16xf32>
    %9 = vector.shape_cast %8 : vector<4x16x16xf32> to vector<4x256xf32>
    %c8 = arith.constant 8 : index
    %c0_7 = arith.constant 0 : index
    %10 = vector.load %arg6[%c8, %c0_7] : memref<36x256xf32, #tpu.memory_space<vmem>>, vector<4x256xf32>
    tpu.vector_store %arg6[%c8, %c0_7], %9 {strides = array<i32>} : memref<36x256xf32, #tpu.memory_space<vmem>>, vector<4x256xf32>,
    %11 = vector.extract_strided_slice %1 {offsets = [0, 1, 0], sizes = [4, 16, 16], strides = [1, 1, 1]} : vector<4x18x18xf32> to vector<4x16x16xf32>
    %12 = vector.shape_cast %11 : vector<4x16x16xf32> to vector<4x256xf32>
    %c12 = arith.constant 12 : index
    %c0_8 = arith.constant 0 : index
    %13 = vector.load %arg6[%c12, %c0_8] : memref<36x256xf32, #tpu.memory_space<vmem>>, vector<4x256xf32>
    tpu.vector_store %arg6[%c12, %c0_8], %12 {strides = array<i32>} : memref<36x256xf32, #tpu.memory_space<vmem>>, vector<4x256xf32>,
    %14 = vector.extract_strided_slice %1 {offsets = [0, 1, 1], sizes = [4, 16, 16], strides = [1, 1, 1]} : vector<4x18x18xf32> to vector<4x16x16xf32>
    %15 = vector.shape_cast %14 : vector<4x16x16xf32> to vector<4x256xf32>
    %c16 = arith.constant 16 : index
    %c0_9 = arith.constant 0 : index
    %16 = vector.load %arg6[%c16, %c0_9] : memref<36x256xf32, #tpu.memory_space<vmem>>, vector<4x256xf32>
    tpu.vector_store %arg6[%c16, %c0_9], %15 {strides = array<i32>} : memref<36x256xf32, #tpu.memory_space<vmem>>, vector<4x256xf32>,
    %17 = vector.extract_strided_slice %1 {offsets = [0, 1, 2], sizes = [4, 16, 16], strides = [1, 1, 1]} : vector<4x18x18xf32> to vector<4x16x16xf32>
    %18 = vector.shape_cast %17 : vector<4x16x16xf32> to vector<4x256xf32>
    %c20 = arith.constant 20 : index
    %c0_10 = arith.constant 0 : index
    %19 = vector.load %arg6[%c20, %c0_10] : memref<36x256xf32, #tpu.memory_space<vmem>>, vector<4x256xf32>
    tpu.vector_store %arg6[%c20, %c0_10], %18 {strides = array<i32>} : memref<36x256xf32, #tpu.memory_space<vmem>>, vector<4x256xf32>,
    %20 = vector.extract_strided_slice %1 {offsets = [0, 2, 0], sizes = [4, 16, 16], strides = [1, 1, 1]} : vector<4x18x18xf32> to vector<4x16x16xf32>
    %21 = vector.shape_cast %20 : vector<4x16x16xf32> to vector<4x256xf32>
    %c24 = arith.constant 24 : index
    %c0_11 = arith.constant 0 : index
    %22 = vector.load %arg6[%c24, %c0_11] : memref<36x256xf32, #tpu.memory_space<vmem>>, vector<4x256xf32>
    tpu.vector_store %arg6[%c24, %c0_11], %21 {strides = array<i32>} : memref<36x256xf32, #tpu.memory_space<vmem>>, vector<4x256xf32>,
    %23 = vector.extract_strided_slice %1 {offsets = [0, 2, 1], sizes = [4, 16, 16], strides = [1, 1, 1]} : vector<4x18x18xf32> to vector<4x16x16xf32>
    %24 = vector.shape_cast %23 : vector<4x16x16xf32> to vector<4x256xf32>
    %c28 = arith.constant 28 : index
    %c0_12 = arith.constant 0 : index
    %25 = vector.load %arg6[%c28, %c0_12] : memref<36x256xf32, #tpu.memory_space<vmem>>, vector<4x256xf32>
    tpu.vector_store %arg6[%c28, %c0_12], %24 {strides = array<i32>} : memref<36x256xf32, #tpu.memory_space<vmem>>, vector<4x256xf32>,
    %26 = vector.extract_strided_slice %1 {offsets = [0, 2, 2], sizes = [4, 16, 16], strides = [1, 1, 1]} : vector<4x18x18xf32> to vector<4x16x16xf32>
    %27 = vector.shape_cast %26 : vector<4x16x16xf32> to vector<4x256xf32>
    %c32 = arith.constant 32 : index
    %c0_13 = arith.constant 0 : index
    %28 = vector.load %arg6[%c32, %c0_13] : memref<36x256xf32, #tpu.memory_space<vmem>>, vector<4x256xf32>
    tpu.vector_store %arg6[%c32, %c0_13], %27 {strides = array<i32>} : memref<36x256xf32, #tpu.memory_space<vmem>>, vector<4x256xf32>,
    %c0_14 = arith.constant 0 : index
    %c0_15 = arith.constant 0 : index
    %29 = vector.load %arg3[%c0_14, %c0_15] : memref<8x36xf32, #tpu.memory_space<vmem>>, vector<8x36xf32>
    %c0_16 = arith.constant 0 : index
    %c0_17 = arith.constant 0 : index
    %30 = vector.load %arg6[%c0_16, %c0_17] : memref<36x256xf32, #tpu.memory_space<vmem>>, vector<36x256xf32>
    %cst = arith.constant dense<0.000000e+00> : vector<8x256xf32>
    %31 = tpu.matmul %29, %30, %cst {dimension_numbers = #tpu.dot_dimension_numbers<[1], [0], [0], [1], [0, 0, 1, 1], [], []>} : vector<8x36xf32>, vector<36x256xf32>, vector<8x256xf32> -> vector<8x256xf32>
    %c0_18 = arith.constant 0 : index
    %c0_19 = arith.constant 0 : index
    %c0_20 = arith.constant 0 : index
    %32 = vector.load %arg4[%c0_18, %c0_19, %c0_20] : memref<1x8x256xf32, #tpu.memory_space<vmem>>, vector<1x8x256xf32>
    %33 = vector.shape_cast %32 : vector<1x8x256xf32> to vector<8x256xf32>
    %34 = vector.shape_cast %31 : vector<8x256xf32> to vector<1x8x256xf32>
    tpu.vector_store %arg4[%c0_18, %c0_19, %c0_20], %34 {strides = array<i32>} : memref<1x8x256xf32, #tpu.memory_space<vmem>>, vector<1x8x256xf32>,
    %cst_21 = arith.constant dense<0.000000e+00> : vector<8xf32>
    %35 = vector.multi_reduction <add>, %31, %cst_21 [1] : vector<8x256xf32> to vector<8xf32>
    %36 = vector.shape_cast %35 : vector<8xf32> to vector<8x1xf32>
    %37 = arith.mulf %31, %31 : vector<8x256xf32>
    %cst_22 = arith.constant dense<0.000000e+00> : vector<8xf32>
    %38 = vector.multi_reduction <add>, %37, %cst_22 [1] : vector<8x256xf32> to vector<8xf32>
    %39 = vector.shape_cast %38 : vector<8xf32> to vector<8x1xf32>
    %c0_i32 = arith.constant 0 : i32
    %40 = arith.cmpi eq, %arg1, %c0_i32 : i32
    %41 = arith.extui %40 : i1 to i32
    %c0_i32_23 = arith.constant 0 : i32
    %42 = arith.cmpi ne, %41, %c0_i32_23 : i32
    scf.if %42 {
      %cst_30 = arith.constant 0.000000e+00 : f32
      %50 = vector.broadcast %cst_30 : f32 to vector<1x8x2xf32>
      %c0_31 = arith.constant 0 : index
      %c0_32 = arith.constant 0 : index
      %c0_33 = arith.constant 0 : index
      %51 = vector.load %arg5[%c0_31, %c0_32, %c0_33] : memref<1x8x2xf32, #tpu.memory_space<vmem>>, vector<1x8x2xf32>
      tpu.vector_store %arg5[%c0_31, %c0_32, %c0_33], %50 {strides = array<i32>} : memref<1x8x2xf32, #tpu.memory_space<vmem>>, vector<1x8x2xf32>,
    } else {
    }
    %c0_24 = arith.constant 0 : index
    %c0_25 = arith.constant 0 : index
    %c0_26 = arith.constant 0 : index
    %43 = vector.load %arg5[%c0_24, %c0_25, %c0_26] : memref<1x8x2xf32, #tpu.memory_space<vmem>>, vector<1x8x2xf32>
    %44 = vector.shape_cast %43 : vector<1x8x2xf32> to vector<8x2xf32>
    %45 = tpu.concatenate %36, %39 in 1 : vector<8x1xf32>, vector<8x1xf32> -> vector<8x2xf32>
    %46 = arith.addf %44, %45 : vector<8x2xf32>
    %c0_27 = arith.constant 0 : index
    %c0_28 = arith.constant 0 : index
    %c0_29 = arith.constant 0 : index
    %47 = vector.load %arg5[%c0_27, %c0_28, %c0_29] : memref<1x8x2xf32, #tpu.memory_space<vmem>>, vector<1x8x2xf32>
    %48 = vector.shape_cast %47 : vector<1x8x2xf32> to vector<8x2xf32>
    %49 = vector.shape_cast %46 : vector<8x2xf32> to vector<1x8x2xf32>
    tpu.vector_store %arg5[%c0_27, %c0_28, %c0_29], %49 {strides = array<i32>} : memref<1x8x2xf32, #tpu.memory_space<vmem>>, vector<1x8x2xf32>,
    return
  }
  func.func @transform_0(%arg0: i32, %arg1: i32) -> (i32, i32, i32, i32, i32) {
    %c0_i32 = arith.constant 0 : i32
    %c0_i32_0 = arith.constant 0 : i32
    %c0_i32_1 = arith.constant 0 : i32
    %c0_i32_2 = arith.constant 0 : i32
    return %arg0, %c0_i32, %arg1, %c0_i32_0, %c0_i32_1 : i32, i32, i32, i32, i32
  }
  func.func @transform_1(%arg0: i32, %arg1: i32) -> (i32, i32) {
    %c0_i32 = arith.constant 0 : i32
    %c0_i32_0 = arith.constant 0 : i32
    %c0_i32_1 = arith.constant 0 : i32
    return %c0_i32, %c0_i32_0 : i32, i32
  }
  func.func @transform_2(%arg0: i32, %arg1: i32) -> (i32, i32, i32) {
    %c0_i32 = arith.constant 0 : i32
    %c0_i32_0 = arith.constant 0 : i32
    return %arg0, %c0_i32, %arg1 : i32, i32, i32
  }
  func.func @transform_3(%arg0: i32, %arg1: i32) -> (i32, i32, i32) {
    %c0_i32 = arith.constant 0 : i32
    %c0_i32_0 = arith.constant 0 : i32
    %c0_i32_1 = arith.constant 0 : i32
    return %arg0, %c0_i32, %c0_i32_0 : i32, i32, i32
  }
}

</mosaic_0001>

<bundles_post_ra>
// kernel: tpu_custom_call.1
= control target key start
LH: loop header
LB: loop body
LE: loop exit
PB: predicated region body
PF: predicated region fallthrough
CT: control target
= control target key end

     0   :  { %9 = vsyncpa [#allocation4], 0  ;;  %s3893_s0 = inlined_call_operand.vmem [shape: f32[2,4,1,18,18], index: 0, kind: input, shape index: {}]   ;;  %s3894_s1 = inlined_call_operand.vmem [shape: f32[8,36], index: 1, kind: input, shape index: {}]   ;;  %s3895_s2 = inlined_call_operand.hbm [shape: f32[2,8,256], index: 2, kind: output, shape index: {0}]   ;;  %s3896_s3 = inlined_call_operand.vmem [shape: f32[2,8,2], index: 3, kind: output, shape index: {1}]  }
   0x1   :  { %11 = vsyncpa [#allocation4 + $0x1], 0  ;;  %s2542_s12 = smov 0   ;;  %s2544_s13 = smov 0  }
   0x2   :  { %s2546_s14 = smov 0   ;;  %s2548_s15 = smov 0  }
   0x3   :  { %s2550_s16 = smov 0   ;;  %s2552_s17 = smov 0  }
   0x4 LB: > { %s2336_s18 = sadd.s32 4294967295, %s2508_s17   ;;  %s2337_s19 = sadd.s32 4294967294, %s2508_s17   ;;  %s2508_s17 = sphi %s2552_s17, %s17_s17   ;;  %s2504_s16 = sphi %s2550_s16, %s3912_s16   ;;  %s2500_s15 = sphi %s2548_s15, %s3911_s15   ;;  %s2496_s14 = sphi %s2546_s14, %s3910_s14   ;;  %s2492_s13 = sphi %s2544_s13, %s3909_s13   ;;  %s2488_s12 = sphi %s2542_s12, %s3908_s12  }
   0x5   : > { %s29_s20 = sadd.s32 1, %s2504_s16  ;;  %s87_s21 = sadd.s32 1, %s2496_s14 }
   0x6   : > { %p31_p0 = scmp.ge.s32.totalorder %s29_s20, 2  ;;  %p97_p1 = scmp.ne.s32.totalorder %s2496_s14, %s2492_s13 }
   0x7   : > { %p98_p2 = scmp.eq.s32.totalorder %s2336_s18, 1  ;;  %p103_p3 = scmp.ne.s32.totalorder %s2492_s13, %s2488_s12 }
   0x8   : > { %s3914_s20 = smov (%p31_p0, %s29_s20), 0  ;;  %p104_p5 = scmp.eq.s32.totalorder %s2337_s19, 1 }
   0x9   : > { %p2582_p4 = por %p98_p2, %p97_p1  ;;  %s82_s23 = ssub.s32 %s2504_s16, %s3914_s20 }
   0xa   : > { %p2340_p6 = scmp.ge.s32.totalorder %s2508_s17, 1  ;;  %p85_p7 = scmp.eq.s32.totalorder %s82_s23, 0 }
   0xb   : > { %p2589_p8 = por %p104_p5, %p103_p3  ;;  %p163_p9 = scmp.lt.s32.totalorder %s2508_s17, 3 }
   0xc   : > { %s2595_s25 = scalar_select %p85_p7, %s2496_s14, %s87_s21  }
   0xd   : > { %p164_p10 = pnand %p2340_p6, %p163_p9 }
   0xf   : > { %167 = sbr.rel (%p164_p10) target bundleno = 1198 (0x4ae), region = 28 }
  0x14   : > { %p195_p11 = scmp.lt.s32.totalorder %s2500_s15, 1  ;;  %v2510_v0 = vmov 1983009808   ;;  %vm222_vm0 = vcmask 1047556   ;;  %v2511_v9 = vmov 1934713408  }
  0x15   : > { %v227_v1 = vunpack.c.l.s4 %v2510_v0  ;;  %v251_v10 = vunpack.c.l.s4 %v2511_v9  ;;  %s2512_s4 = smov 64   ;;  %s2513_s5 = smov 32   ;;  %vm390_vm1 = vcmask 130048   ;;  %vm392_vm2 = vcmask 261120  }
  0x16   : > { %s2599_s26 = scalar_select %p195_p11, %s2500_s15, 1  ;;  %vm394_vm3 = vcmask 392192   ;;  %vm396_vm4 = vcmask 523264   ;;  %vm398_vm5 = vcmask 654336   ;;  %vm400_vm6 = vcmask 785408  }
  0x17   : > { %v2616_v5 = vunpack.c.0.s8 %v227_v1  ;;  %v2649_v25 = vunpack.c.0.s8 %v251_v10  ;;  %s2514_s6 = smov 96   ;;  %s2515_s7 = smov 48   ;;  %vm402_vm7 = vcmask 916480   ;;  %vm847_vm8 = vcmask 1046528  }
  0x18   : > { %s2354_s27 = smul.u32 96, %s2599_s26  ;;  %s2516_s8 = smov 16   ;;  %vm1488_vm9 = vcmask 1045504   ;;  %vm2138_vm10 = vcmask 1043456   ;;  %vm2134_vm11 = vcmask 293888  }
  0x19   : > { %s2517_s9 = smov 112   ;;  %s2518_s10 = smov 80  }
  0x1a   : > { %s2605_s30 = scalar_lea.vmem %s3893_s0, %s2354_s27  ;;  %s2519_s11 = smov 127  }
  0x1b   : > { %v2608_v2 = vld [vmem:[%s2605_s30] sm:$0xff]  ;;  %v2611_v3 = vld [vmem:[%s2605_s30 + $0x18] sm:$0xff]  ;;  %v2614_v4 = vld [vmem:[%s2605_s30 + $0x30] sm:$0xff]  ;;  %s2520_s18 = smov 126   ;;  %s186_s23 = sand.u32 1, %s2492_s13  }
  0x1c   : > { %v2619_v6 = vld [vmem:[%s2605_s30 + $0x48] sm:$0xff]  ;;  %v224_v7 = vrot.slane %v2608_v2, 4  ;;  %v236_v8 = vrot.slane %v2611_v3, 4  ;;  %v221_v11 = vrot.slane %v2614_v4, 4  ;;  %v2626_v13 = vld [vmem:[%s2605_s30 + $0x38] sm:$0xff]  ;;  %v2629_v14 = vld [vmem:[%s2605_s30 + $0x50] sm:$0xff] }
  0x1d   : > { %v234_v12 = vrot.slane %v2619_v6, 4  ;;  %v2638_v18 = vld [vmem:[%s2605_s30 + $0x8] sm:$0xff]  ;;  %v278_v19 = vrot.slane %v2626_v13, 4  ;;  %v2647_v24 = vld [vmem:[%s2605_s30 + $0x20] sm:$0xff]  ;;  %v290_v27 = vrot.slane %v2629_v14, 4  ;;  %s2341_s27 = sshll.u32 %s186_s23, 4 }
  0x1e   : > { %v225_v15 = vsel %vm222_vm0, %v2614_v4, %v224_v7  ;;  %v237_v16 = vsel %vm222_vm0, %v2619_v6, %v236_v8  ;;  %v223_v17 = vsel %vm222_vm0, %v221_v11, %v2608_v2  ;;  %v292_v34 = vrot.slane %v2647_v24, 4  ;;  %s2353_s28 = sshll.u32 %s2500_s15, 4 }
  0x1f   : > { %v233_v20 = vperm.slane %v225_v15, %v2616_v5  ;;  %v245_v21 = vperm.slane %v237_v16, %v2616_v5  ;;  %v229_v22 = vperm.slane %v223_v17, %v2616_v5  ;;  %v235_v23 = vsel %vm222_vm0, %v234_v12, %v2611_v3 }
  0x20   : > { %v241_v26 = vperm.slane %v235_v23, %v2616_v5  ;;  %v279_v31 = vsel %vm222_vm0, %v278_v19, %v2638_v18  ;;  %v291_v33 = vsel %vm222_vm0, %v290_v27, %v2647_v24  ;;  %v280_v50 = vrot.slane %v2638_v18, 4 }
  0x21   : > { %v258_v28 = vrot.slane %v245_v21, 4  ;;  %v260_v29 = vrot.slane %v233_v20, 4  ;;  %v248_v30 = vrot.slane %v229_v22, 4  ;;  %v297_v37 = vperm.slane %v291_v33, %v2616_v5 }
  0x22   : > { %v246_v32 = vrot.slane %v241_v26, 4  ;;  %v285_v42 = vperm.slane %v279_v31, %v2616_v5  ;;  %v293_v51 = vsel %vm222_vm0, %v2629_v14, %v292_v34  ;;  %v281_v57 = vsel %vm222_vm0, %v2626_v13, %v280_v50 }
  0x23   : > { %v259_v35 = vsel %vm222_vm0, %v258_v28, %v233_v20  ;;  %v249_v36 = vsel %vm222_vm0, %v241_v26, %v248_v30  ;;  %v261_v38 = vsel %vm222_vm0, %v245_v21, %v260_v29  ;;  %v302_v44 = vrot.slane %v297_v37, 4 }
  0x24   : > { %v265_v39 = vperm.slane %v259_v35, %v2649_v25  ;;  %v257_v40 = vperm.slane %v249_v36, %v2649_v25  ;;  %v247_v41 = vsel %vm222_vm0, %v246_v32, %v229_v22  ;;  %v269_v45 = vperm.slane %v261_v38, %v2649_v25 }
  0x25   : > { %v2667_v43 = vperm.slane %v247_v41, %v2649_v25  ;;  %v304_v46 = vrot.slane %v285_v42, 4  ;;  %v303_v49 = vsel %vm222_vm0, %v302_v44, %v285_v42  ;;  %v301_v56 = vperm.slane %v293_v51, %v2616_v5 }
  0x26   : > { %347 = vrot.lane.b32.xlu1 %v265_v39, %s2512_s4  ;;  %339 = vrot.lane.b32.xlu0 %v257_v40, %s2513_s5  ;;  %v272_v47 = vrot.slane %v257_v40, 4  ;;  %v2682_v55 = vperm.slane %v303_v49, %v2649_v25  ;;  %v276_v60 = vrot.slane %v269_v45, 4  ;;  %v289_v61 = vperm.slane %v281_v57, %v2616_v5 }
  0x27   : > { %v270_v48 = vrot.slane %v2667_v43, 4  ;;  %355 = vrot.lane.b32.xlu2 %v269_v45, %s2514_s6  ;;  %v305_v52 = vsel %vm222_vm0, %v297_v37, %v304_v46  ;;  %v314_v62 = vrot.slane %v301_v56, 4  ;;  %v274_v63 = vrot.slane %v265_v39, 4 }
  0x28   : > { %v273_v53 = vsel %vm222_vm0, 0.0, %v272_v47  ;;  %v313_v58 = vperm.slane %v305_v52, %v2649_v25  ;;  %v326_v59 = vrot.slane %v2682_v55, 4  ;;  %v277_v1 = vsel %vm222_vm0, 0.0, %v276_v60 }
  0x29   : > { %v271_v54 = vsel %vm222_vm0, 0.0, %v270_v48  ;;  %v315_v7 = vsel %vm222_vm0, %v314_v62, %v289_v61  ;;  %v316_v8 = vrot.slane %v289_v61, 4  ;;  %v275_v9 = vsel %vm222_vm0, 0.0, %v274_v63 }
  0x2a   : > { %v327_v0 = vsel %vm222_vm0, 0.0, %v326_v59  ;;  %v321_v10 = vperm.slane %v315_v7, %v2649_v25  ;;  %v328_v11 = vrot.slane %v313_v58, 4 }
  0x2b   : > { %v317_v12 = vsel %vm222_vm0, %v301_v56, %v316_v8 }
  0x2c   : > { %v330_v15 = vrot.slane %v321_v10, 4  ;;  %v329_v16 = vsel %vm222_vm0, 0.0, %v328_v11  ;;  %v325_v17 = vperm.slane %v317_v12, %v2649_v25 }
  0x2e   : > { %343 = vrot.lane.b32.xlu1 %v273_v53, %s2515_s7  ;;  %335 = vrot.lane.b32.xlu0 %v271_v54, %s2516_s8  ;;  %v331_v19 = vsel %vm222_vm0, 0.0, %v330_v15  ;;  %v332_v20 = vrot.slane %v325_v17, 4 }
  0x2f   : > { %367 = vrot.lane.b32.xlu2 %v313_v58, %s2513_s5 }
  0x30   : > { %v333_v21 = vsel %vm222_vm0, 0.0, %v332_v20 }
  0x36   : > { %363 = vrot.lane.b32.xlu1 %v327_v0, %s2516_s8  ;;  %359 = vrot.lane.b32.xlu0 %v277_v1, %s2517_s9 }
  0x37   : > { %351 = vrot.lane.b32.xlu2 %v275_v9, %s2518_s10 }
  0x3e   : > { %375 = vrot.lane.b32.xlu1 %v321_v10, %s2512_s4  ;;  %371 = vrot.lane.b32.xlu0 %v329_v16, %s2515_s7 }
  0x3f   : > { %379 = vrot.lane.b32.xlu2 %v331_v19, %s2518_s10 }
  0x46   : > { %387 = vrot.lane.b32.xlu1 %v333_v21, %s2517_s9  ;;  %383 = vrot.lane.b32.xlu0 %v325_v17, %s2514_s6 }
  0x47   : > { %421 = vrot.lane.b32.xlu2 %v2608_v2, %s2519_s11 }
  0x4e   : > { %425 = vrot.lane.b32.xlu1 %v2611_v3, %s2519_s11  ;;  %423 = vrot.lane.b32.xlu0 %v2638_v18, %s2519_s11 }
  0x4f   : > { %427 = vrot.lane.b32.xlu2 %v2647_v24, %s2519_s11 }
  0x56   : > { %431 = vrot.lane.b32.xlu1 %v2626_v13, %s2519_s11  ;;  %429 = vrot.lane.b32.xlu0 %v2614_v4, %s2519_s11 }
  0x57   : > { %433 = vrot.lane.b32.xlu2 %v2619_v6, %s2519_s11 }
  0x5e   : > { %637 = vrot.lane.b32.xlu1 %v2638_v18, %s2520_s18  ;;  %435 = vrot.lane.b32.xlu0 %v2629_v14, %s2519_s11 }
  0x5f   : > { %639 = vrot.lane.b32.xlu2 %v2611_v3, %s2520_s18 }
  0x66   : > { %643 = vrot.lane.b32.xlu1 %v2614_v4, %s2520_s18  ;;  %635 = vrot.lane.b32.xlu0 %v2608_v2, %s2520_s18 }
  0x67   : > { %645 = vrot.lane.b32.xlu2 %v2626_v13, %s2520_s18 }
  0x6e   : > { %649 = vrot.lane.b32.xlu1 %v2629_v14, %s2520_s18  ;;  %641 = vrot.lane.b32.xlu0 %v2647_v24, %s2520_s18 }
  0x76   : > { %647 = vrot.lane.b32.xlu0 %v2619_v6, %s2520_s18 }
  0x81   : > { %v356_v22 = vpop.permute.xlu2 %355 }
  0x89   : > { %v368_v23 = vpop.permute.xlu2 %367 }
  0x91   : > { %v352_v28 = vpop.permute.xlu2 %351 }
  0x98   : > { %v348_v26 = vpop.permute.xlu1 %347  ;;  %v340_v27 = vpop.permute.xlu0 %339 }
  0x99   : > { %v380_v32 = vpop.permute.xlu2 %379 }
  0xa0   : > { %v344_v29 = vpop.permute.xlu1 %343  ;;  %v336_v30 = vpop.permute.xlu0 %335 }
  0xa1   : > { %v391_v31 = vsel %vm390_vm1, %v2667_v43, %v336_v30  ;;  %v422_v41 = vpop.permute.xlu2 %421 }
  0xa2   : > { %v393_v33 = vsel %vm392_vm2, %v391_v31, %v340_v27  ;;  %v447_v59 = vrot.slane %v422_v41, 4 }
  0xa3   : > { %v395_v34 = vsel %vm394_vm3, %v393_v33, %v344_v29 }
  0xa4   : > { %v397_v35 = vsel %vm396_vm4, %v395_v34, %v348_v26 }
  0xa5   : > { %v399_v36 = vsel %vm398_vm5, %v397_v35, %v352_v28 }
  0xa6   : > { %v401_v38 = vsel %vm400_vm6, %v399_v36, %v356_v22 }
  0xa8   : > { %v364_v37 = vpop.permute.xlu1 %363  ;;  %v360_v39 = vpop.permute.xlu0 %359 }
  0xa9   : > { %v403_v40 = vsel %vm402_vm7, %v401_v38, %v360_v39  ;;  %v404_v42 = vsel %vm390_vm1, %v2682_v55, %v364_v37  ;;  %v428_v48 = vpop.permute.xlu2 %427 }
  0xaa   : > { %411 = vst [vmem:[#allocation2 + $0x30] sm:$0xf] %v403_v40  ;;  %v405_v43 = vsel %vm392_vm2, %v404_v42, %v368_v23  ;;  %v515_v19 = vrot.slane %v428_v48, 4 }
  0xb0   : > { %v376_v44 = vpop.permute.xlu1 %375  ;;  %v372_v45 = vpop.permute.xlu0 %371 }
  0xb1   : > { %v406_v46 = vsel %vm394_vm3, %v405_v43, %v372_v45  ;;  %v434_v54 = vpop.permute.xlu2 %433 }
  0xb2   : > { %v407_v47 = vsel %vm396_vm4, %v406_v46, %v376_v44  ;;  %v457_v61 = vrot.slane %v434_v54, 4 }
  0xb3   : > { %v408_v50 = vsel %vm398_vm5, %v407_v47, %v380_v32 }
  0xb8   : > { %v388_v49 = vpop.permute.xlu1 %387  ;;  %v384_v51 = vpop.permute.xlu0 %383 }
  0xb9   : > { %v409_v52 = vsel %vm400_vm6, %v408_v50, %v384_v51  ;;  %v640_v47 = vpop.permute.xlu2 %639 }
  0xba   : > { %v410_v53 = vsel %vm402_vm7, %v409_v52, %v388_v49 }
  0xbb   : > { %412 = vst [vmem:[#allocation2] sm:$0xf] %v410_v53 }
  0xc0   : > { %v426_v55 = vpop.permute.xlu1 %425  ;;  %v424_v56 = vpop.permute.xlu0 %423 }
  0xc1   : > { %v459_v57 = vrot.slane %v426_v55, 4  ;;  %v503_v62 = vrot.slane %v424_v56, 4  ;;  %v458_v10 = vsel %vm222_vm0, %v457_v61, %v426_v55  ;;  %v2821_v55 = vpop.permute.xlu2 %645  ;;  %v673_v61 = vrot.slane %v640_v47, 4 }
  0xc2   : > { %v2770_v20 = vperm.slane %v458_v10, %v2616_v5 }
  0xc3   : > { %v460_v58 = vsel %vm222_vm0, %v434_v54, %v459_v57  ;;  %v715_v57 = vrot.slane %v2821_v55, 4 }
  0xc4   : > { %v468_v60 = vperm.slane %v460_v58, %v2616_v5 }
  0xc6   : > { %v481_v1 = vrot.slane %v468_v60, 4 }
  0xc8   : > { %v432_v63 = vpop.permute.xlu1 %431  ;;  %v430_v0 = vpop.permute.xlu0 %429 }
  0xc9   : > { %v501_v7 = vrot.slane %v432_v63, 4  ;;  %v445_v8 = vrot.slane %v430_v0, 4  ;;  %v448_v9 = vsel %vm222_vm0, %v430_v0, %v447_v59  ;;  %v504_v12 = vsel %vm222_vm0, %v432_v63, %v503_v62 }
  0xca   : > { %v456_v11 = vperm.slane %v448_v9, %v2616_v5  ;;  %v512_v23 = vperm.slane %v504_v12, %v2616_v5 }
  0xcb   : > { %v446_v15 = vsel %vm222_vm0, %v445_v8, %v422_v41  ;;  %v502_v21 = vsel %vm222_vm0, %v501_v7, %v424_v56 }
  0xcc   : > { %v2767_v16 = vperm.slane %v446_v15, %v2616_v5  ;;  %v483_v17 = vrot.slane %v456_v11, 4  ;;  %v482_v22 = vsel %vm222_vm0, %v481_v1, %v456_v11  ;;  %v2784_v30 = vperm.slane %v502_v21, %v2616_v5 }
  0xcd   : > { %v2776_v26 = vperm.slane %v482_v22, %v2649_v25  ;;  %v539_v37 = vrot.slane %v512_v23, 4 }
  0xce   : > { %v484_v27 = vsel %vm222_vm0, %v468_v60, %v483_v17  ;;  %v471_v28 = vrot.slane %v2767_v16, 4  ;;  %v527_v43 = vrot.slane %v2784_v30, 4 }
  0xcf   : > { %v2781_v29 = vperm.slane %v484_v27, %v2649_v25  ;;  %570 = vrot.lane.b32.xlu1 %v2776_v26, %s2512_s4 }
  0xd0   : > { %v2788_v31 = vpop.permute.xlu1 %637  ;;  %v436_v32 = vpop.permute.xlu0 %435  ;;  %v472_v33 = vsel %vm222_vm0, %v2770_v20, %v471_v28 }
  0xd1   : > { %v513_v34 = vrot.slane %v436_v32, 4  ;;  %v516_v35 = vsel %vm222_vm0, %v436_v32, %v515_v19  ;;  %578 = vrot.lane.b32.xlu0 %v2781_v29, %s2514_s6  ;;  %v2796_v36 = vperm.slane %v472_v33, %v2649_v25  ;;  %v716_v0 = vsel %vm222_vm0, %v715_v57, %v2788_v31 }
  0xd2   : > { %v524_v38 = vperm.slane %v516_v35, %v2616_v5  ;;  %v722_v11 = vperm.slane %v716_v0, %v2616_v5  ;;  %v469_v33 = vrot.slane %v2770_v20, 4  ;;  %v499_v57 = vrot.slane %v2781_v29, 4 }
  0xd3   : > { %v514_v39 = vsel %vm222_vm0, %v513_v34, %v428_v48  ;;  %562 = vrot.lane.b32.xlu2 %v2796_v36, %s2513_s5  ;;  %v859_v29 = vrot.slane %v2626_v13, 1 }
  0xd4   : > { %v520_v40 = vperm.slane %v514_v39, %v2616_v5  ;;  %v537_v41 = vrot.slane %v524_v38, 4  ;;  %v540_v42 = vsel %vm222_vm0, %v524_v38, %v539_v37  ;;  %v741_v37 = vrot.slane %v722_v11, 4 }
  0xd5   : > { %v2806_v44 = vperm.slane %v540_v42, %v2649_v25  ;;  %v470_v20 = vsel %vm222_vm0, %v469_v33, %v2767_v16  ;;  %v495_v42 = vrot.slane %v2796_v36, 4 }
  0xd6   : > { %v528_v45 = vsel %vm222_vm0, %v520_v40, %v527_v43  ;;  %v538_v46 = vsel %vm222_vm0, %v537_v41, %v512_v23  ;;  %v525_v38 = vrot.slane %v520_v40, 4  ;;  %v497_v41 = vrot.slane %v2776_v26, 4 }
  0xd7   : > { %v2811_v48 = vperm.slane %v528_v45, %v2649_v25  ;;  %606 = vrot.lane.b32.xlu1 %v2806_v44, %s2514_s6  ;;  %v544_v50 = vperm.slane %v538_v46, %v2649_v25  ;;  %v2868_v45 = vperm.slane %v470_v20, %v2649_v25  ;;  %v496_v16 = vsel %vm222_vm0, 0.0, %v495_v42 }
  0xd8   : > { %v636_v49 = vpop.permute.xlu0 %635  ;;  %v644_v51 = vpop.permute.xlu1 %643  ;;  %v526_v40 = vsel %vm222_vm0, %v525_v38, %v2784_v30  ;;  %v498_v46 = vsel %vm222_vm0, 0.0, %v497_v41 }
  0xd9   : > { %590 = vrot.lane.b32.xlu0 %v2811_v48, %s2513_s5  ;;  %v661_v52 = vrot.slane %v636_v49, 4  ;;  %v659_v54 = vrot.slane %v644_v51, 4  ;;  %v2875_v26 = vperm.slane %v526_v40, %v2649_v25  ;;  %v493_v36 = vrot.slane %v2868_v45, 4 }
  0xdb   : > { %598 = vrot.lane.b32.xlu2 %v544_v50, %s2512_s4  ;;  %v662_v56 = vsel %vm222_vm0, %v644_v51, %v661_v52  ;;  %v660_v59 = vsel %vm222_vm0, %v659_v54, %v636_v49  ;;  %v549_v30 = vrot.slane %v2875_v26, 4  ;;  %v494_v49 = vsel %vm222_vm0, 0.0, %v493_v36 }
  0xdc   : > { %v670_v60 = vperm.slane %v662_v56, %v2616_v5  ;;  %v666_v63 = vperm.slane %v660_v59, %v2616_v5  ;;  %v555_v59 = vrot.slane %v2806_v44, 4  ;;  %v500_v44 = vsel %vm222_vm0, 0.0, %v499_v57 }
  0xdd   : > { %v550_v51 = vsel %vm222_vm0, 0.0, %v549_v30 }
  0xde   : > { %v697_v10 = vrot.slane %v670_v60, 4  ;;  %v685_v17 = vrot.slane %v666_v63, 4 }
  0xe0   : > { %v2819_v53 = vpop.permute.xlu0 %641  ;;  %v2825_v58 = vpop.permute.xlu1 %649 }
  0xe1   : > { %v727_v62 = vrot.slane %v2825_v58, 4 }
  0xe3   : > { %v728_v12 = vsel %vm222_vm0, %v727_v62, %v2819_v53  ;;  %v729_v62 = vrot.slane %v2819_v53, 4  ;;  %v854_v53 = vrot.slane %v2647_v24, 1 }
  0xe4   : > { %v734_v27 = vperm.slane %v728_v12, %v2616_v5  ;;  %v848_v12 = vrot.slane %v2608_v2, 1 }
  0xe6   : > { %v742_v39 = vsel %vm222_vm0, %v734_v27, %v741_v37  ;;  %v739_v54 = vrot.slane %v734_v27, 4 }
  0xe7   : > { %v2863_v43 = vperm.slane %v742_v39, %v2649_v25 }
  0xe8   : > { %v648_v1 = vpop.permute.xlu0 %647 }
  0xe9   : > { %v671_v7 = vrot.slane %v648_v1, 4  ;;  %v674_v8 = vsel %vm222_vm0, %v648_v1, %v673_v61  ;;  %v717_v61 = vrot.slane %v2788_v31, 4  ;;  %v740_v1 = vsel %vm222_vm0, %v739_v54, %v722_v11 }
  0xea   : > { %v682_v9 = vperm.slane %v674_v8, %v2616_v5  ;;  %v858_v8 = vrot.slane %v2614_v4, 1  ;;  %v853_v31 = vrot.slane %v2611_v3, 1  ;;  %v730_v4 = vsel %vm222_vm0, %v2825_v58, %v729_v62 }
  0xeb   : > { %v672_v15 = vsel %vm222_vm0, %v671_v7, %v640_v47  ;;  %v553_v47 = vrot.slane %v544_v50, 4  ;;  %v863_v50 = vrot.slane %v2619_v6, 1  ;;  %v556_v6 = vsel %vm222_vm0, 0.0, %v555_v59  ;;  %v2973_v59 = vld [vmem:[%s2605_s30 + $0x28] sm:$0x3] }
  0xec   : > { %v678_v19 = vperm.slane %v672_v15, %v2616_v5  ;;  %v695_v21 = vrot.slane %v682_v9, 4  ;;  %v698_v22 = vsel %vm222_vm0, %v682_v9, %v697_v10  ;;  %v2911_v10 = vperm.slane %v740_v1, %v2649_v25 }
  0xed   : > { %v2842_v23 = vperm.slane %v698_v22, %v2649_v25  ;;  %v554_v52 = vsel %vm222_vm0, 0.0, %v553_v47  ;;  %v718_v3 = vsel %vm222_vm0, %v2821_v55, %v717_v61  ;;  %v849_v15 = vrot.slane %v2638_v18, 1 }
  0xee   : > { %v696_v28 = vsel %vm222_vm0, %v695_v21, %v670_v60  ;;  %v686_v32 = vsel %vm222_vm0, %v678_v19, %v685_v17  ;;  %v683_v56 = vrot.slane %v678_v19, 4  ;;  %v864_v60 = vrot.slane %v2629_v14, 1 }
  0xef   : > { %792 = vrot.lane.b32.xlu1 %v2842_v23, %s2514_s6  ;;  %v702_v34 = vperm.slane %v696_v28, %v2649_v25  ;;  %v2852_v35 = vperm.slane %v686_v32, %v2649_v25  ;;  %v2925_v58 = vsel %vm847_vm8, %v858_v8, %v859_v29  ;;  %v551_v17 = vrot.slane %v2811_v48, 4 }
  0xf0   : > { %v684_v7 = vsel %vm222_vm0, %v683_v56, %v666_v63  ;;  %v2905_v9 = vsel %vm847_vm8, %v863_v50, %v864_v60  ;;  %v738_v21 = vperm.slane %v730_v4, %v2616_v5  ;;  %v2933_v55 = vsel %vm847_vm8, %v853_v31, %v854_v53  ;;  %v2970_v56 = vld [vmem:[%s2605_s30 + $0x40] sm:$0x3] }
  0xf1   : > { %784 = vrot.lane.b32.xlu2 %v702_v34, %s2512_s4  ;;  %776 = vrot.lane.b32.xlu0 %v2852_v35, %s2513_s5  ;;  %v711_v0 = vrot.slane %v702_v34, 4  ;;  %v2914_v11 = vperm.slane %v684_v7, %v2649_v25  ;;  %v888_v19 = vrot.slane %v2905_v9, 4  ;;  %v726_v2 = vperm.slane %v718_v3, %v2616_v5  ;;  %v2982_v7 = vld [vmem:[%s2605_s30 + $0x58] sm:$0x3] }
  0xf2   : > { %v763_v22 = vrot.slane %v2911_v10, 4  ;;  %v876_v28 = vrot.slane %v2925_v58, 4  ;;  %v2942_v48 = vsel %vm847_vm8, %v848_v12, %v849_v15  ;;  %v552_v32 = vsel %vm222_vm0, 0.0, %v551_v17 }
  0xf3   : > { %v712_v63 = vsel %vm222_vm0, 0.0, %v711_v0  ;;  %v707_v27 = vrot.slane %v2914_v11, 4  ;;  %v889_v33 = vsel %vm222_vm0, %v888_v19, %v2933_v55  ;;  %v751_v34 = vrot.slane %v738_v21, 4 }
  0xf4   : > { %v753_v37 = vrot.slane %v726_v2, 4  ;;  %v764_v38 = vsel %vm222_vm0, 0.0, %v763_v22  ;;  %v877_v20 = vsel %vm222_vm0, %v876_v28, %v2942_v48  ;;  %v895_v41 = vperm.slane %v889_v33, %v2616_v5 }
  0xf5   : > { %v708_v39 = vsel %vm222_vm0, 0.0, %v707_v27  ;;  %v709_v42 = vrot.slane %v2852_v35, 4  ;;  %v752_v40 = vsel %vm222_vm0, %v751_v34, %v726_v2  ;;  %v890_v54 = vrot.slane %v2933_v55, 4 }
  0xf6   : > { %v754_v36 = vsel %vm222_vm0, %v738_v21, %v753_v37  ;;  %v900_v30 = vrot.slane %v895_v41, 4  ;;  %v765_v61 = vrot.slane %v2863_v43, 4  ;;  %v878_v0 = vrot.slane %v2942_v48, 4 }
  0xf7   : > { %804 = vrot.lane.b32.xlu1 %v2863_v43, %s2513_s5  ;;  %v710_v47 = vsel %vm222_vm0, 0.0, %v709_v42  ;;  %v762_v35 = vperm.slane %v754_v36, %v2649_v25  ;;  %v861_v8 = vrot.slane %v2970_v56, 1  ;;  %v856_v31 = vrot.slane %v2973_v59, 1 }
  0xf8   : > { %v766_v3 = vsel %vm222_vm0, 0.0, %v765_v61  ;;  %v879_v12 = vsel %vm222_vm0, %v2925_v58, %v878_v0  ;;  %v866_v17 = vrot.slane %v2982_v7, 1 }
  0xf9   : > { %574 = vrot.lane.b32.xlu2 %v498_v46, %s2518_s10  ;;  %566 = vrot.lane.b32.xlu0 %v496_v16, %s2515_s7  ;;  %v883_v46 = vperm.slane %v877_v20, %v2616_v5  ;;  %v713_v16 = vrot.slane %v2842_v23, 4  ;;  %v769_v50 = vrot.slane %v762_v35, 4  ;;  %v3005_v22 = vsel %vm847_vm8, %v859_v29, %v861_v8 }
  0xfa   : > { %v3012_v27 = vsel %vm847_vm8, %v854_v53, %v856_v31  ;;  %v3018_v33 = vsel %vm847_vm8, %v864_v60, %v866_v17  ;;  %v932_v13 = vrot.slane %v3005_v22, 4 }
  0xfb   : > { %v901_v23 = vsel %vm222_vm0, %v900_v30, %v883_v46  ;;  %v946_v53 = vrot.slane %v3012_v27, 4  ;;  %v944_v14 = vrot.slane %v3018_v33, 4 }
  0xfc   : > { %v2979_v1 = vperm.slane %v901_v23, %v2649_v25 }
  0xfd   : > { %v947_v18 = vsel %vm222_vm0, %v3018_v33, %v946_v53  ;;  %v945_v42 = vsel %vm222_vm0, %v944_v14, %v3012_v27 }
  0xfe   : > { %v924_v19 = vrot.slane %v2979_v1, 4  ;;  %v951_v30 = vperm.slane %v945_v42, %v2616_v5 }
  0xff   : > { %558 = vrot.lane.b32.xlu1 %v494_v49, %s2516_s8  ;;  %v758_v49 = vperm.slane %v752_v40, %v2649_v25 }
 0x100   : > { %v925_v29 = vsel %vm222_vm0, 0.0, %v924_v19 }
 0x101   : > { %586 = vrot.lane.b32.xlu2 %v550_v51, %s2516_s8  ;;  %602 = vrot.lane.b32.xlu0 %v554_v52, %s2518_s10  ;;  %v902_v51 = vrot.slane %v883_v46, 4  ;;  %v714_v52 = vsel %vm222_vm0, 0.0, %v713_v16  ;;  %v767_v57 = vrot.slane %v758_v49, 4  ;;  %v955_v46 = vperm.slane %v947_v18, %v2616_v5 }
 0x103   : > { %v903_v62 = vsel %vm222_vm0, %v895_v41, %v902_v51  ;;  %v768_v43 = vsel %vm222_vm0, 0.0, %v767_v57  ;;  %v956_v51 = vrot.slane %v951_v30, 4 }
 0x104   : > { %v911_v4 = vperm.slane %v903_v62, %v2649_v25 }
 0x106   : > { %v926_v28 = vrot.slane %v911_v4, 4 }
 0x107   : > { %582 = vrot.lane.b32.xlu1 %v500_v44, %s2517_s9  ;;  %v891_v44 = vsel %vm222_vm0, %v2905_v9, %v890_v54 }
 0x108   : > { %v899_v21 = vperm.slane %v891_v44, %v2616_v5  ;;  %v927_v37 = vsel %vm222_vm0, 0.0, %v926_v28 }
 0x109   : > { %610 = vrot.lane.b32.xlu2 %v556_v6, %s2517_s9  ;;  %788 = vrot.lane.b32.xlu0 %v712_v63, %s2518_s10  ;;  %v2988_v6 = vld [vmem:[%s2605_s30 + $0x10] sm:$0x3]  ;;  %v770_v63 = vsel %vm222_vm0, 0.0, %v769_v50 }
 0x10a   : > { %v851_v2 = vrot.slane %v2988_v6, 1  ;;  %v912_v34 = vrot.slane %v899_v21, 4 }
 0x10c   : > { %v3025_v24 = vsel %vm847_vm8, %v849_v15, %v851_v2 }
 0x10d   : > { %v933_v60 = vsel %vm222_vm0, %v932_v13, %v3025_v24  ;;  %v934_v20 = vrot.slane %v3025_v24, 4 }
 0x10e   : > { %v939_v41 = vperm.slane %v933_v60, %v2616_v5 }
 0x10f   : > { %594 = vrot.lane.b32.xlu1 %v552_v32, %s2515_s7  ;;  %v887_v32 = vperm.slane %v879_v12, %v2616_v5  ;;  %v935_v16 = vsel %vm222_vm0, %v3005_v22, %v934_v20 }
 0x110   : > { %v957_v50 = vsel %vm222_vm0, %v956_v51, %v939_v41 }
 0x111   : > { %800 = vrot.lane.b32.xlu0 %v764_v38, %s2516_s8  ;;  %772 = vrot.lane.b32.xlu2 %v708_v39, %s2516_s8  ;;  %v914_v38 = vrot.slane %v887_v32, 4  ;;  %v913_v39 = vsel %vm222_vm0, %v912_v34, %v887_v32  ;;  %v3061_v44 = vperm.slane %v957_v50, %v2649_v25 }
 0x112   : > { %v919_v40 = vperm.slane %v913_v39, %v2649_v25 }
 0x113   : > { %v915_v15 = vsel %vm222_vm0, %v899_v21, %v914_v38 }
 0x114   : > { %v923_v36 = vperm.slane %v915_v15, %v2649_v25  ;;  %v928_v54 = vrot.slane %v919_v40, 4 }
 0x116   : > { %v929_v0 = vsel %vm222_vm0, 0.0, %v928_v54 }
 0x117   : > { %780 = vrot.lane.b32.xlu1 %v710_v47, %s2515_s7  ;;  %v958_v47 = vrot.slane %v939_v41, 4 }
 0x119   : > { %812 = vrot.lane.b32.xlu0 %v758_v49, %s2512_s4  ;;  %796 = vrot.lane.b32.xlu2 %v714_v52, %s2517_s9  ;;  %v943_v49 = vperm.slane %v935_v16, %v2616_v5  ;;  %v930_v52 = vrot.slane %v923_v36, 4  ;;  %v959_v23 = vsel %vm222_vm0, %v951_v30, %v958_v47 }
 0x11a   : > { %v967_v62 = vperm.slane %v959_v23, %v2649_v25 }
 0x11b   : > { %v931_v61 = vsel %vm222_vm0, 0.0, %v930_v52  ;;  %v970_v12 = vrot.slane %v943_v49, 4 }
 0x11c   : > { %v982_v31 = vrot.slane %v967_v62, 4 }
 0x11d   : > { %v971_v21 = vsel %vm222_vm0, %v955_v46, %v970_v12 }
 0x11e   : > { %v979_v28 = vperm.slane %v971_v21, %v2649_v25 }
 0x11f   : > { %816 = vrot.lane.b32.xlu1 %v768_v43, %s2518_s10 }
 0x120   : > { %v986_v32 = vrot.slane %v979_v28, 4 }
 0x121   : > { %824 = vrot.lane.b32.xlu0 %v770_v63, %s2517_s9  ;;  %808 = vrot.lane.b32.xlu2 %v766_v3, %s2515_s7  ;;  %v980_v63 = vrot.slane %v3061_v44, 4  ;;  %v983_v3 = vsel %vm222_vm0, 0.0, %v982_v31 }
 0x123   : > { %v981_v19 = vsel %vm222_vm0, 0.0, %v980_v63 }
 0x127   : > { %989 = vrot.lane.b32.xlu1 %v925_v29, %s2516_s8  ;;  %v987_v29 = vsel %vm222_vm0, 0.0, %v986_v32 }
 0x129   : > { %997 = vrot.lane.b32.xlu0 %v927_v37, %s2515_s7  ;;  %820 = vrot.lane.b32.xlu2 %v762_v35, %s2514_s6  ;;  %v968_v35 = vrot.slane %v955_v46, 4 }
 0x12b   : > { %v969_v57 = vsel %vm222_vm0, %v968_v35, %v943_v49 }
 0x12c   : > { %v975_v8 = vperm.slane %v969_v57, %v2649_v25 }
 0x12d   : > { %v563_v43 = vpop.permute.xlu2 %562 }
 0x12f   : > { %1001 = vrot.lane.b32.xlu1 %v919_v40, %s2512_s4 }
 0x131   : > { %1009 = vrot.lane.b32.xlu0 %v923_v36, %s2514_s6  ;;  %993 = vrot.lane.b32.xlu2 %v911_v4, %s2513_s5  ;;  %v984_v4 = vrot.slane %v975_v8, 4 }
 0x133   : > { %v985_v17 = vsel %vm222_vm0, 0.0, %v984_v4 }
 0x135   : > { %v599_v2 = vpop.permute.xlu2 %598 }
 0x137   : > { %1013 = vrot.lane.b32.xlu1 %v931_v61, %s2517_s9 }
 0x139   : > { %1021 = vrot.lane.b32.xlu0 %v967_v62, %s2513_s5  ;;  %1005 = vrot.lane.b32.xlu2 %v929_v0, %s2518_s10 }
 0x13f   : > { %1025 = vrot.lane.b32.xlu1 %v983_v3, %s2515_s7 }
 0x141   : > { %1033 = vrot.lane.b32.xlu0 %v985_v17, %s2518_s10  ;;  %1017 = vrot.lane.b32.xlu2 %v981_v19, %s2516_s8  ;;  %v571_v34 = vpop.permute.xlu1 %570 }
 0x143   : > { %v579_v53 = vpop.permute.xlu0 %578 }
 0x147   : > { %1037 = vrot.lane.b32.xlu1 %v979_v28, %s2514_s6 }
 0x149   : > { %1066 = vrot.lane.b32.xlu0 %v2942_v48, %s2519_s11  ;;  %1029 = vrot.lane.b32.xlu2 %v975_v8, %s2512_s4  ;;  %v607_v38 = vpop.permute.xlu1 %606 }
 0x14b   : > { %v785_v13 = vpop.permute.xlu2 %784  ;;  %v591_v14 = vpop.permute.xlu0 %590 }
 0x14f   : > { %1068 = vrot.lane.b32.xlu1 %v3025_v24, %s2519_s11 }
 0x151   : > { %1072 = vrot.lane.b32.xlu0 %v3012_v27, %s2519_s11  ;;  %1041 = vrot.lane.b32.xlu2 %v987_v29, %s2517_s9 }
 0x153   : > { %v575_v37 = vpop.permute.xlu2 %574 }
 0x157   : > { %1074 = vrot.lane.b32.xlu1 %v2925_v58, %s2519_s11 }
 0x159   : > { %1078 = vrot.lane.b32.xlu0 %v2905_v9, %s2519_s11  ;;  %1070 = vrot.lane.b32.xlu2 %v2933_v55, %s2519_s11 }
 0x15b   : > { %v587_v60 = vpop.permute.xlu2 %586 }
 0x15f   : > { %1080 = vrot.lane.b32.xlu1 %v3018_v33, %s2519_s11 }
 0x161   : > { %v793_v39 = vpop.permute.xlu1 %792  ;;  %1076 = vrot.lane.b32.xlu2 %v3005_v22, %s2519_s11 }
 0x163   : > { %v611_v20 = vpop.permute.xlu2 %610  ;;  %v777_v18 = vpop.permute.xlu0 %776 }
 0x169   : > { %v805_v15 = vpop.permute.xlu1 %804 }
 0x16b   : > { %v773_v41 = vpop.permute.xlu2 %772  ;;  %v567_v42 = vpop.permute.xlu0 %566 }
 0x16c   : > { %v827_v3 = vsel %vm390_vm1, %v2914_v11, %v773_v41 }
 0x16d   : > { %v828_v19 = vsel %vm392_vm2, %v827_v3, %v777_v18 }
 0x171   : > { %v559_v40 = vpop.permute.xlu1 %558 }
 0x172   : > { %v613_v46 = vsel %vm390_vm1, %v2868_v45, %v559_v40  ;;  %v620_v45 = vsel %vm390_vm1, %v2875_v26, %v587_v60 }
 0x173   : > { %v614_v16 = vsel %vm392_vm2, %v613_v46, %v563_v43  ;;  %v797_v36 = vpop.permute.xlu2 %796  ;;  %v603_v30 = vpop.permute.xlu0 %602  ;;  %v621_v62 = vsel %vm392_vm2, %v620_v45, %v591_v14 }
 0x174   : > { %v615_v47 = vsel %vm394_vm3, %v614_v16, %v567_v42 }
 0x175   : > { %v616_v49 = vsel %vm396_vm4, %v615_v47, %v571_v34 }
 0x176   : > { %v617_v35 = vsel %vm398_vm5, %v616_v49, %v575_v37 }
 0x177   : > { %v618_v52 = vsel %vm400_vm6, %v617_v35, %v579_v53 }
 0x179   : > { %v583_v51 = vpop.permute.xlu1 %582 }
 0x17a   : > { %v619_v23 = vsel %vm402_vm7, %v618_v52, %v583_v51 }
 0x17b   : > { %v629_v54 = vrot.slane %v619_v23, 4  ;;  %v809_v57 = vpop.permute.xlu2 %808  ;;  %v789_v50 = vpop.permute.xlu0 %788 }
 0x17d   : > { %633 = vst [vmem:[#allocation2 + $0x30] sm:$0xf0] %v629_v54 }
 0x181   : > { %v595_v61 = vpop.permute.xlu1 %594 }
 0x182   : > { %v622_v0 = vsel %vm394_vm3, %v621_v62, %v595_v61 }
 0x183   : > { %v623_v8 = vsel %vm396_vm4, %v622_v0, %v599_v2  ;;  %v821_v31 = vpop.permute.xlu2 %820  ;;  %v801_v43 = vpop.permute.xlu0 %800 }
 0x184   : > { %v624_v4 = vsel %vm398_vm5, %v623_v8, %v603_v30  ;;  %v834_v21 = vsel %vm390_vm1, %v2911_v10, %v801_v43 }
 0x185   : > { %v625_v63 = vsel %vm400_vm6, %v624_v4, %v607_v38  ;;  %v835_v11 = vsel %vm392_vm2, %v834_v21, %v805_v15 }
 0x186   : > { %v626_v12 = vsel %vm402_vm7, %v625_v63, %v611_v20  ;;  %v836_v38 = vsel %vm394_vm3, %v835_v11, %v809_v57 }
 0x187   : > { %v630_v17 = vrot.slane %v626_v12, 4 }
 0x189   : > { %634 = vst [vmem:[#allocation2] sm:$0xf0] %v630_v17  ;;  %v781_v26 = vpop.permute.xlu1 %780 }
 0x18a   : > { %v829_v2 = vsel %vm394_vm3, %v828_v19, %v781_v26  ;;  %v2422_v19 = vld [vmem:[%s2605_s30 + $0x48] sm:$0xff] }
 0x18b   : > { %v830_v28 = vsel %vm396_vm4, %v829_v2, %v785_v13  ;;  %v813_v32 = vpop.permute.xlu0 %812  ;;  %v994_v29 = vpop.permute.xlu2 %993  ;;  %v1504_v21 = vrot.slane %v2422_v19, 2  ;;  %v2423_v2 = vld [vmem:[%s2605_s30 + $0x50] sm:$0xff] }
 0x18c   : > { %v831_v34 = vsel %vm398_vm5, %v830_v28, %v789_v50  ;;  %v837_v14 = vsel %vm396_vm4, %v836_v38, %v813_v32  ;;  %v1505_v28 = vrot.slane %v2423_v2, 2 }
 0x18d   : > { %v832_v53 = vsel %vm400_vm6, %v831_v34, %v793_v39 }
 0x18e   : > { %v833_v37 = vsel %vm402_vm7, %v832_v53, %v797_v36  ;;  %v3147_v53 = vsel %vm1488_vm9, %v1504_v21, %v1505_v28 }
 0x18f   : > { %841 = vst [vmem:[#allocation2 + $0x18] sm:$0xf] %v833_v37 }
 0x191   : > { %v817_v10 = vpop.permute.xlu1 %816 }
 0x192   : > { %v838_v60 = vsel %vm398_vm5, %v837_v14, %v817_v10  ;;  %v1529_v14 = vrot.slane %v3147_v53, 4 }
 0x193   : > { %v839_v13 = vsel %vm400_vm6, %v838_v60, %v821_v31  ;;  %v825_v20 = vpop.permute.xlu0 %824  ;;  %v1006_v18 = vpop.permute.xlu2 %1005 }
 0x194   : > { %v840_v41 = vsel %vm402_vm7, %v839_v13, %v825_v20  ;;  %v2424_v13 = vld [vmem:[%s2605_s30 + $0x18] sm:$0xff] }
 0x195   : > { %842 = vst [vmem:[#allocation2 + $0x10] sm:$0xf] %v840_v41  ;;  %v1494_v20 = vrot.slane %v2424_v13, 2 }
 0x199   : > { %v990_v15 = vpop.permute.xlu1 %989 }
 0x19a   : > { %v1044_v39 = vsel %vm390_vm1, %v2979_v1, %v990_v15 }
 0x19b   : > { %v998_v42 = vpop.permute.xlu0 %997  ;;  %v1018_v40 = vpop.permute.xlu2 %1017  ;;  %v1045_v46 = vsel %vm392_vm2, %v1044_v39, %v994_v29  ;;  %v1507_v29 = vrot.slane %v2982_v7, 2 }
 0x19c   : > { %v1046_v36 = vsel %vm394_vm3, %v1045_v46, %v998_v42  ;;  %v1051_v1 = vsel %vm390_vm1, %v3061_v44, %v1018_v40 }
 0x19d   : > { %v3151_v60 = vsel %vm1488_vm9, %v1505_v28, %v1507_v29 }
 0x19e   : > { %v1585_v42 = vrot.slane %v3151_v60, 4 }
 0x1a1   : > { %v1002_v16 = vpop.permute.xlu1 %1001 }
 0x1a2   : > { %v1047_v30 = vsel %vm396_vm4, %v1046_v36, %v1002_v16 }
 0x1a3   : > { %v1010_v47 = vpop.permute.xlu0 %1009  ;;  %v1048_v49 = vsel %vm398_vm5, %v1047_v30, %v1006_v18  ;;  %v1030_v35 = vpop.permute.xlu2 %1029  ;;  %v2425_v18 = vld [vmem:[%s2605_s30 + $0x20] sm:$0xff] }
 0x1a4   : > { %v1049_v51 = vsel %vm400_vm6, %v1048_v49, %v1010_v47  ;;  %v1495_v41 = vrot.slane %v2425_v18, 2 }
 0x1a6   : > { %v3161_v36 = vsel %vm1488_vm9, %v1494_v20, %v1495_v41 }
 0x1a9   : > { %v1014_v52 = vpop.permute.xlu1 %1013 }
 0x1aa   : > { %v1050_v23 = vsel %vm402_vm7, %v1049_v51, %v1014_v52 }
 0x1ab   : > { %v1060_v54 = vrot.slane %v1050_v23, 4  ;;  %v1022_v57 = vpop.permute.xlu0 %1021  ;;  %v1042_v50 = vpop.permute.xlu2 %1041 }
 0x1ac   : > { %v1052_v61 = vsel %vm392_vm2, %v1051_v1, %v1022_v57  ;;  %v1497_v1 = vrot.slane %v2973_v59, 2 }
 0x1ad   : > { %1064 = vst [vmem:[#allocation2 + $0x18] sm:$0xf0] %v1060_v54  ;;  %v1531_v54 = vrot.slane %v3161_v36, 4 }
 0x1b1   : > { %v1026_v45 = vpop.permute.xlu1 %1025 }
 0x1b2   : > { %v1053_v62 = vsel %vm394_vm3, %v1052_v61, %v1026_v45 }
 0x1b3   : > { %v1034_v0 = vpop.permute.xlu0 %1033  ;;  %v1054_v8 = vsel %vm396_vm4, %v1053_v62, %v1030_v35  ;;  %v1071_v4 = vpop.permute.xlu2 %1070  ;;  %v3167_v35 = vsel %vm222_vm0, %v1529_v14, %v3161_v36 }
 0x1b4   : > { %v1055_v31 = vsel %vm398_vm5, %v1054_v8, %v1034_v0  ;;  %v1104_v37 = vrot.slane %v1071_v4, 4 }
 0x1b9   : > { %v1038_v43 = vpop.permute.xlu1 %1037 }
 0x1ba   : > { %v1056_v63 = vsel %vm400_vm6, %v1055_v31, %v1038_v43  ;;  %v3182_v31 = vsel %vm222_vm0, %v3147_v53, %v1531_v54  ;;  %v1498_v43 = vsel %vm1488_vm9, %v1495_v41, %v1497_v1 }
 0x1bb   : > { %v1057_v3 = vsel %vm402_vm7, %v1056_v63, %v1042_v50  ;;  %v1067_v44 = vpop.permute.xlu0 %1066  ;;  %v1077_v32 = vpop.permute.xlu2 %1076  ;;  %v1587_v28 = vrot.slane %v1498_v43, 4 }
 0x1bc   : > { %v1061_v12 = vrot.slane %v1057_v3, 4  ;;  %v1146_v34 = vrot.slane %v1077_v32, 4  ;;  %v1092_v38 = vrot.slane %v1067_v44, 4  ;;  %v3187_v3 = vsel %vm222_vm0, %v1585_v42, %v1498_v43 }
 0x1be   : > { %1065 = vst [vmem:[#allocation2 + $0x10] sm:$0xf0] %v1061_v12 }
 0x1c1   : > { %v1069_v17 = vpop.permute.xlu1 %1068 }
 0x1c2   : > { %v1148_v11 = vrot.slane %v1069_v17, 4  ;;  %v1147_v39 = vsel %vm222_vm0, %v1146_v34, %v1069_v17 }
 0x1c3   : > { %v1073_v26 = vpop.permute.xlu0 %1072  ;;  %v1153_v0 = vperm.slane %v1147_v39, %v2616_v5 }
 0x1c4   : > { %v1149_v40 = vsel %vm222_vm0, %v1077_v32, %v1148_v11  ;;  %v1160_v8 = vrot.slane %v1073_v26, 4 }
 0x1c5   : > { %v1157_v50 = vperm.slane %v1149_v40, %v2616_v5  ;;  %v1172_v32 = vrot.slane %v1153_v0, 4 }
 0x1c7   : > { %v1184_v19 = vrot.slane %v1157_v50, 4 }
 0x1c9   : > { %v1075_v10 = vpop.permute.xlu1 %1074 }
 0x1ca   : > { %v1090_v15 = vrot.slane %v1075_v10, 4  ;;  %v1093_v7 = vsel %vm222_vm0, %v1075_v10, %v1092_v38  ;;  %v3202_v10 = vsel %vm222_vm0, %v3151_v60, %v1587_v28 }
 0x1cb   : > { %v1101_v46 = vperm.slane %v1093_v7, %v2616_v5  ;;  %v1079_v16 = vpop.permute.xlu0 %1078 }
 0x1cc   : > { %v1091_v30 = vsel %vm222_vm0, %v1090_v15, %v1067_v44  ;;  %v1102_v47 = vrot.slane %v1079_v16, 4  ;;  %v1105_v49 = vsel %vm222_vm0, %v1079_v16, %v1104_v37 }
 0x1cd   : > { %v1097_v51 = vperm.slane %v1091_v30, %v2616_v5  ;;  %v1128_v52 = vrot.slane %v1101_v46, 4  ;;  %v1113_v23 = vperm.slane %v1105_v49, %v2616_v5  ;;  %v1502_v30 = vrot.slane %v2970_v56, 2  ;;  %v2428_v56 = vld [vmem:[%s2605_s30] sm:$0xff]  ;;  %v2429_v49 = vld [vmem:[%s2605_s30 + $0x8] sm:$0xff] }
 0x1ce   : > { %v1103_v57 = vsel %vm222_vm0, %v1102_v47, %v1071_v4 }
 0x1cf   : > { %v1116_v45 = vrot.slane %v1097_v51, 4  ;;  %v1109_v61 = vperm.slane %v1103_v57, %v2616_v5  ;;  %v3177_v62 = vsel %vm222_vm0, %v1113_v23, %v1128_v52  ;;  %v1126_v15 = vrot.slane %v1113_v23, 4 }
 0x1d0   : > { %3899 = vst [vmem:[#allocation6_spill] sm:$0xff] %v3177_v62 }
 0x1d1   : > { %v1114_v4 = vrot.slane %v1109_v61, 4  ;;  %v1081_v63 = vpop.permute.xlu1 %1080  ;;  %v1117_v59 = vsel %vm222_vm0, %v1109_v61, %v1116_v45  ;;  %v1127_v39 = vsel %vm222_vm0, %v1126_v15, %v1101_v46  ;;  %v2426_v46 = vld [vmem:[%s2605_s30 + $0x38] sm:$0xff] }
 0x1d2   : > { %v1158_v44 = vrot.slane %v1081_v63, 4  ;;  %v1161_v12 = vsel %vm222_vm0, %v1081_v63, %v1160_v8  ;;  %v1125_v17 = vperm.slane %v1117_v59, %v2649_v25  ;;  %v3223_v40 = vperm.slane %v1127_v39, %v2649_v25 }
 0x1d3   : > { %v1169_v21 = vperm.slane %v1161_v12, %v2616_v5  ;;  %v1115_v2 = vsel %vm222_vm0, %v1114_v4, %v1097_v51  ;;  %v1500_v16 = vrot.slane %v2426_v46, 2  ;;  %v1490_v51 = vrot.slane %v2429_v49, 2 }
 0x1d4   : > { %v1159_v29 = vsel %vm222_vm0, %v1158_v44, %v1073_v26  ;;  %1207 = vrot.lane.b32.xlu0 %v1125_v17, %s2513_s5  ;;  %v1140_v34 = vrot.slane %v1125_v17, 4  ;;  %v1121_v11 = vperm.slane %v1115_v2, %v2649_v25 }
 0x1d5   : > { %v1165_v37 = vperm.slane %v1159_v29, %v2616_v5  ;;  %v1182_v38 = vrot.slane %v1169_v21, 4  ;;  %v3198_v14 = vsel %vm222_vm0, %v1169_v21, %v1184_v19 }
 0x1d6   : > { %3900 = vst [vmem:[#allocation7_spill] sm:$0xff] %v3198_v14  ;;  %v1141_v13 = vsel %vm222_vm0, 0.0, %v1140_v34  ;;  %v1138_v20 = vrot.slane %v1121_v11, 4 }
 0x1d7   : > { %v1170_v18 = vrot.slane %v1165_v37, 4  ;;  %1211 = vrot.lane.b32.xlu1 %v1141_v13, %s2515_s7  ;;  %v3207_v26 = vsel %vm222_vm0, %v1165_v37, %v1172_v32  ;;  %v3210_v41 = vsel %vm222_vm0, %v1182_v38, %v1157_v50 }
 0x1d8   : > { %3901 = vst [vmem:[#allocation8_spill] sm:$0xff] %v3210_v41  ;;  %v1139_v7 = vsel %vm222_vm0, 0.0, %v1138_v20 }
 0x1d9   : > { %1203 = vrot.lane.b32.xlu2 %v1139_v7, %s2516_s8  ;;  %v3215_v42 = vsel %vm222_vm0, %v1170_v18, %v1153_v0 }
 0x1dc   : > { %1713 = vrot.lane.b32.xlu0 %v3147_v53, %s2519_s11 }
 0x1df   : > { %1715 = vrot.lane.b32.xlu1 %v3151_v60, %s2519_s11 }
 0x1e1   : > { %1215 = vrot.lane.b32.xlu2 %v3223_v40, %s2512_s4 }
 0x1e4   : > { %1929 = vrot.lane.b32.xlu0 %v3151_v60, %s2520_s18  ;;  %v3241_v60 = vsel %vm1488_vm9, %v1500_v16, %v1502_v30 }
 0x1e5   : > { %v1573_v7 = vrot.slane %v3241_v60, 4 }
 0x1e7   : > { %1286 = vrot.lane.b32.xlu1 %v2905_v9, %s2520_s18  ;;  %v2427_v9 = vld [vmem:[%s2605_s30 + $0x30] sm:$0xff] }
 0x1e8   : > { %v1499_v47 = vrot.slane %v2427_v9, 2 }
 0x1e9   : > { %1927 = vrot.lane.b32.xlu2 %v3147_v53, %s2520_s18 }
 0x1ea   : > { %v3247_v53 = vsel %vm1488_vm9, %v1499_v47, %v1500_v16  ;;  %v3329_v16 = vperm.slane %v3187_v3, %v2616_v5 }
 0x1eb   : > { %v1517_v9 = vrot.slane %v3247_v53, 4 }
 0x1ec   : > { %1705 = vrot.lane.b32.xlu0 %v3161_v36, %s2519_s11 }
 0x1ef   : > { %1707 = vrot.lane.b32.xlu1 %v1498_v43, %s2519_s11 }
 0x1f1   : > { %1288 = vrot.lane.b32.xlu2 %v3018_v33, %s2520_s18  ;;  %v1489_v33 = vrot.slane %v2428_v56, 2 }
 0x1f3   : > { %v3268_v52 = vsel %vm1488_vm9, %v1489_v33, %v1490_v51 }
 0x1f4   : > { %1711 = vrot.lane.b32.xlu0 %v3241_v60, %s2519_s11 }
 0x1f7   : > { %1919 = vrot.lane.b32.xlu1 %v3161_v36, %s2520_s18  ;;  %v1492_v36 = vrot.slane %v2988_v6, 2 }
 0x1f9   : > { %1709 = vrot.lane.b32.xlu2 %v3247_v53, %s2519_s11 }
 0x1fc   : > { %1923 = vrot.lane.b32.xlu0 %v3247_v53, %s2520_s18 }
 0x1ff   : > { %1925 = vrot.lane.b32.xlu1 %v3241_v60, %s2520_s18 }
 0x201   : > { %1921 = vrot.lane.b32.xlu2 %v1498_v43, %s2520_s18 }
 0x204   : > { %1280 = vrot.lane.b32.xlu0 %v3012_v27, %s2520_s18  ;;  %v3273_v27 = vsel %vm1488_vm9, %v1490_v51, %v1492_v36  ;;  %v3341_v36 = vperm.slane %v3167_v35, %v2616_v5 }
 0x205   : > { %v1574_v33 = vsel %vm222_vm0, %v1573_v7, %v3273_v27 }
 0x206   : > { %v1541_v7 = vrot.slane %v3341_v36, 4 }
 0x207   : > { %1282 = vrot.lane.b32.xlu1 %v2925_v58, %s2520_s18 }
 0x209   : > { %1278 = vrot.lane.b32.xlu2 %v2933_v55, %s2520_s18 }
 0x20c   : > { %1701 = vrot.lane.b32.xlu0 %v3268_v52, %s2519_s11 }
 0x20f   : > { %1703 = vrot.lane.b32.xlu1 %v3273_v27, %s2519_s11 }
 0x211   : > { %1284 = vrot.lane.b32.xlu2 %v3005_v22, %s2520_s18 }
 0x214   : > { %1917 = vrot.lane.b32.xlu0 %v3273_v27, %s2520_s18 }
 0x217   : > { %1274 = vrot.lane.b32.xlu1 %v2942_v48, %s2520_s18 }
 0x219   : > { %1915 = vrot.lane.b32.xlu2 %v3268_v52, %s2520_s18 }
 0x221   : > { %1276 = vrot.lane.b32.xlu2 %v3025_v24, %s2520_s18  ;;  %s2450_s18 = scalar_lea.hbm %s3895_s2, 32 }
 0x233   : > { %v1204_v58 = vpop.permute.xlu2 %1203 }
 0x234   : > { %v1258_v23 = vsel %vm390_vm1, %v1121_v11, %v1204_v58 }
 0x23b   : > { %v1216_v55 = vpop.permute.xlu2 %1215 }
 0x243   : > { %v1928_v6 = vpop.permute.xlu2 %1927 }
 0x244   : > { %v1951_v13 = vrot.slane %v1928_v6, 4 }
 0x246   : > { %v1208_v54 = vpop.permute.xlu0 %1207 }
 0x247   : > { %v1259_v22 = vsel %vm392_vm2, %v1258_v23, %v1208_v54 }
 0x249   : > { %v1212_v57 = vpop.permute.xlu1 %1211 }
 0x24a   : > { %v1260_v1 = vsel %vm394_vm3, %v1259_v22, %v1212_v57  ;;  %v1518_v57 = vsel %vm222_vm0, %v1517_v9, %v3268_v52 }
 0x24b   : > { %v3290_v50 = vpop.permute.xlu2 %1288  ;;  %v3293_v48 = vsel %vm396_vm4, %v1260_v1, %v1216_v55  ;;  %v3353_v1 = vperm.slane %v1574_v33, %v2616_v5 }
 0x24c   : > { %3902 = vst [vmem:[#allocation9_spill] sm:$0xff] %v3293_v48 }
 0x24e   : > { %v1714_v45 = vpop.permute.xlu0 %1713 }
 0x24f   : > { %v1737_v35 = vrot.slane %v1714_v45, 4 }
 0x251   : > { %v3295_v61 = vpop.permute.xlu1 %1715 }
 0x253   : > { %v3297_v24 = vpop.permute.xlu2 %1709 }
 0x256   : > { %v1930_v0 = vpop.permute.xlu0 %1929 }
 0x257   : > { %v2007_v23 = vrot.slane %v1930_v0, 4 }
 0x259   : > { %v3299_v8 = vpop.permute.xlu1 %1286 }
 0x25b   : > { %v1922_v43 = vpop.permute.xlu2 %1921 }
 0x25c   : > { %v2009_v4 = vrot.slane %v1922_v43, 4 }
 0x25e   : > { %v3302_v63 = vsel %vm222_vm0, %v1930_v0, %v2009_v4  ;;  %v1706_v59 = vpop.permute.xlu0 %1705 }
 0x25f   : > { %v1739_v44 = vrot.slane %v1706_v59, 4 }
 0x261   : > { %v3305_v12 = vsel %vm222_vm0, %v1714_v45, %v1739_v44  ;;  %v1708_v17 = vpop.permute.xlu1 %1707  ;;  %v1738_v45 = vsel %vm222_vm0, %v1737_v35, %v1706_v59 }
 0x262   : > { %v1795_v19 = vrot.slane %v1708_v17, 4  ;;  %v3388_v59 = vperm.slane %v1738_v45, %v2616_v5 }
 0x263   : > { %v1279_v21 = vpop.permute.xlu2 %1278 }
 0x264   : > { %v3309_v2 = vsel %vm222_vm0, %v3295_v61, %v1795_v19  ;;  %v1312_v28 = vrot.slane %v1279_v21, 4 }
 0x266   : > { %v3313_v32 = vsel %vm222_vm0, %v3299_v8, %v1312_v28  ;;  %v3315_v29 = vpop.permute.xlu0 %1711 }
 0x269   : > { %v1920_v34 = vpop.permute.xlu1 %1919 }
 0x26a   : > { %v1953_v11 = vrot.slane %v1920_v34, 4  ;;  %v1952_v18 = vsel %vm222_vm0, %v1951_v13, %v1920_v34  ;;  %v2008_v13 = vsel %vm222_vm0, %v2007_v23, %v1922_v43  ;;  %v1725_v43 = vrot.slane %v3297_v24, 4 }
 0x26b   : > { %v3317_v37 = vpop.permute.xlu2 %1284  ;;  %v3325_v46 = vperm.slane %v1952_v18, %v2616_v5  ;;  %v1781_v23 = vrot.slane %v3315_v29, 4 }
 0x26c   : > { %v1954_v38 = vsel %vm222_vm0, %v1928_v6, %v1953_v11  ;;  %v1597_v6 = vrot.slane %v3329_v16, 4  ;;  %v1793_v11 = vrot.slane %v3295_v61, 4 }
 0x26d   : > { %v1962_v49 = vperm.slane %v1954_v38, %v2616_v5  ;;  %v1963_v3 = vrot.slane %v3325_v46, 4  ;;  %v1310_v38 = vrot.slane %v3299_v8, 4 }
 0x26e   : > { %v1924_v20 = vpop.permute.xlu0 %1923  ;;  %v1794_v61 = vsel %vm222_vm0, %v1793_v11, %v1708_v17  ;;  %v3384_v8 = vsel %vm222_vm0, %v1597_v6, %v3353_v1  ;;  %v3398_v17 = vperm.slane %v3302_v63, %v2616_v5 }
 0x26f   : > { %v1939_v15 = vrot.slane %v1924_v20, 4  ;;  %v1975_v44 = vrot.slane %v1962_v49, 4  ;;  %v1311_v9 = vsel %vm222_vm0, %v1310_v38, %v1279_v21 }
 0x270   : > { %v3411_v6 = vperm.slane %v1311_v9, %v2616_v5 }
 0x271   : > { %v3322_v39 = vpop.permute.xlu1 %1925 }
 0x273   : > { %v1916_v30 = vpop.permute.xlu2 %1915 }
 0x274   : > { %v1940_v47 = vsel %vm222_vm0, %v1939_v15, %v1916_v30  ;;  %v1941_v56 = vrot.slane %v1916_v30, 4  ;;  %v3379_v30 = vperm.slane %v1518_v57, %v2616_v5  ;;  %v1366_v57 = vrot.slane %v3290_v50, 4 }
 0x275   : > { %v3337_v51 = vperm.slane %v1940_v47, %v2616_v5 }
 0x276   : > { %v1942_v58 = vsel %vm222_vm0, %v1924_v20, %v1941_v56  ;;  %v3345_v55 = vpop.permute.xlu0 %1280  ;;  %v3393_v56 = vperm.slane %v2008_v13, %v2616_v5  ;;  %v1322_v13 = vrot.slane %v3411_v6, 4 }
 0x277   : > { %v1950_v54 = vperm.slane %v1942_v58, %v2616_v5  ;;  %v1368_v22 = vrot.slane %v3345_v55, 4  ;;  %v1964_v4 = vsel %vm222_vm0, %v1963_v3, %v3337_v51  ;;  %v1800_v3 = vperm.slane %v1794_v61, %v2616_v5 }
 0x278   : > { %v3364_v34 = vperm.slane %v1964_v4, %v2649_v25  ;;  %v3408_v58 = vperm.slane %v3309_v2, %v2616_v5  ;;  %v2019_v2 = vrot.slane %v3393_v56, 4 }
 0x279   : > { %v1977_v19 = vrot.slane %v1950_v54, 4  ;;  %v3359_v28 = vsel %vm222_vm0, %v3290_v50, %v1368_v22  ;;  %v3361_v0 = vpop.permute.xlu1 %1282  ;;  %v3372_v18 = vsel %vm222_vm0, %v1975_v44, %v1950_v54  ;;  %v1749_v54 = vrot.slane %v3388_v59, 4 }
 0x27a   : > { %v1987_v20 = vrot.slane %v3364_v34, 4  ;;  %v3420_v22 = vsel %vm222_vm0, %v1541_v7, %v3379_v30  ;;  %v1805_v44 = vrot.slane %v1800_v3, 4  ;;  %v1817_v45 = vrot.slane %v3408_v58, 4 }
 0x27b   : > { %v3375_v15 = vsel %vm222_vm0, %v1962_v49, %v1977_v19  ;;  %v3402_v49 = vperm.slane %v3305_v12, %v2616_v5  ;;  %v1995_v7 = vrot.slane %v3322_v39, 4  ;;  %v1298_v61 = vrot.slane %v3361_v0, 4 }
 0x27c   : > { %v1988_v47 = vsel %vm222_vm0, 0.0, %v1987_v20  ;;  %v1277_v20 = vpop.permute.xlu2 %1276 }
 0x27d   : > { %2052 = vrot.lane.b32.xlu2 %v1988_v47, %s2516_s8  ;;  %v1761_v38 = vrot.slane %v3402_v49, 4  ;;  %v1356_v4 = vrot.slane %v1277_v20, 4 }
 0x27e   : > { %v1702_v33 = vpop.permute.xlu0 %1701 }
 0x27f   : > { %v1726_v21 = vsel %vm222_vm0, %v1725_v43, %v1702_v33  ;;  %v1727_v47 = vrot.slane %v1702_v33, 4 }
 0x280   : > { %v3415_v63 = vperm.slane %v1726_v21, %v2616_v5 }
 0x281   : > { %v1704_v12 = vpop.permute.xlu1 %1703 }
 0x282   : > { %v1782_v35 = vsel %vm222_vm0, %v1781_v23, %v1704_v12  ;;  %v1750_v11 = vsel %vm222_vm0, %v1749_v54, %v3415_v63  ;;  %v1783_v21 = vrot.slane %v1704_v12, 4 }
 0x283   : > { %v1788_v19 = vperm.slane %v1782_v35, %v2616_v5  ;;  %v3433_v50 = vperm.slane %v1750_v11, %v2649_v25 }
 0x285   : > { %v1807_v43 = vrot.slane %v1788_v19, 4  ;;  %v1806_v9 = vsel %vm222_vm0, %v1805_v44, %v1788_v19  ;;  %v1773_v54 = vrot.slane %v3433_v50, 4  ;;  %v1354_v44 = vrot.slane %v3317_v37, 4 }
 0x286   : > { %v1918_v23 = vpop.permute.xlu0 %1917  ;;  %v3440_v35 = vperm.slane %v1806_v9, %v2649_v25  ;;  %v1965_v19 = vrot.slane %v3337_v51, 4 }
 0x287   : > { %v1996_v48 = vsel %vm222_vm0, %v1995_v7, %v1918_v23  ;;  %v1997_v11 = vrot.slane %v1918_v23, 4  ;;  %v1808_v14 = vsel %vm222_vm0, %v1800_v3, %v1807_v43  ;;  %v1774_v41 = vsel %vm222_vm0, 0.0, %v1773_v54 }
 0x288   : > { %v3445_v62 = vperm.slane %v1996_v48, %v2616_v5  ;;  %v3449_v33 = vperm.slane %v1808_v14, %v2649_v25  ;;  %v1829_v12 = vrot.slane %v3440_v35, 4  ;;  %v1367_v7 = vsel %vm222_vm0, %v1366_v57, %v3345_v55  ;;  %1838 = vrot.lane.b32.xlu0 %v1774_v41, %s2516_s8 }
 0x289   : > { %v3458_v3 = vperm.slane %v3359_v28, %v2616_v5  ;;  %v1275_v48 = vpop.permute.xlu1 %1274  ;;  %v1728_v14 = vsel %vm222_vm0, %v3297_v24, %v1727_v47  ;;  %v1784_v43 = vsel %vm222_vm0, %v3315_v29, %v1783_v21  ;;  %v1998_v9 = vsel %vm222_vm0, %v3322_v39, %v1997_v11 }
 0x28a   : > { %v1299_v51 = vsel %vm222_vm0, %v1298_v61, %v1275_v48  ;;  %1870 = vrot.lane.b32.xlu2 %v3449_v33, %s2513_s5  ;;  %v1751_v55 = vrot.slane %v3415_v63, 4  ;;  %v1830_v41 = vsel %vm222_vm0, 0.0, %v1829_v12  ;;  %v2020_v24 = vsel %vm222_vm0, %v2019_v2, %v3445_v62 }
 0x28b   : > { %v3472_v28 = vperm.slane %v1299_v51, %v2616_v5  ;;  %v3479_v29 = vperm.slane %v3313_v32, %v2616_v5  ;;  %v1357_v39 = vsel %vm222_vm0, %v3317_v37, %v1356_v4  ;;  %v1300_v57 = vrot.slane %v1275_v48, 4  ;;  %1866 = vrot.lane.b32.xlu1 %v1830_v41, %s2516_s8 }
 0x28c   : > { %v3485_v63 = vperm.slane %v2020_v24, %v2649_v25  ;;  %v1736_v61 = vperm.slane %v1728_v14, %v2616_v5  ;;  %v1792_v47 = vperm.slane %v1784_v43, %v2616_v5  ;;  %v2006_v21 = vperm.slane %v1998_v9, %v2616_v5 }
 0x28d   : > { %v1323_v2 = vsel %vm222_vm0, %v1322_v13, %v3472_v28  ;;  %v3493_v32 = vperm.slane %v1367_v7, %v2616_v5  ;;  %v1355_v37 = vsel %vm222_vm0, %v1354_v44, %v1277_v20  ;;  %v1390_v54 = vrot.slane %v3458_v3, 4 }
 0x28e   : > { %v2043_v4 = vrot.slane %v3485_v63, 4  ;;  %v3498_v23 = vperm.slane %v1323_v2, %v2649_v25  ;;  %v1365_v11 = vperm.slane %v1357_v39, %v2616_v5  ;;  %v1752_v12 = vsel %vm222_vm0, %v3388_v59, %v1751_v55 }
 0x28f   : > { %v1966_v13 = vsel %vm222_vm0, %v3325_v46, %v1965_v19  ;;  %v1301_v7 = vsel %vm222_vm0, %v3361_v0, %v1300_v57  ;;  %v3512_v48 = vperm.slane %v3384_v8, %v2649_v25  ;;  %v1361_v14 = vperm.slane %v1355_v37, %v2616_v5 }
 0x290   : > { %v2044_v20 = vsel %vm222_vm0, 0.0, %v2043_v4  ;;  %v1346_v44 = vrot.slane %v3498_v23, 4  ;;  %v1762_v59 = vsel %vm222_vm0, %v1761_v38, %v1736_v61  ;;  %v3903_v43 = vrot.slane %v3398_v17, 4 }
 0x291   : > { %2080 = vrot.lane.b32.xlu0 %v2044_v20, %s2516_s8  ;;  %v3523_v0 = vsel %vm222_vm0, %v1817_v45, %v1792_v47  ;;  %v1378_v19 = vrot.slane %v3493_v32, 4  ;;  %v1763_v9 = vrot.slane %v1736_v61, 4  ;;  %v1760_v8 = vperm.slane %v1752_v12, %v2649_v25 }
 0x292   : > { %v3520_v46 = vsel %vm222_vm0, %v3903_v43, %v2006_v21  ;;  %v1347_v51 = vsel %vm222_vm0, 0.0, %v1346_v44  ;;  %v2021_v55 = vrot.slane %v3445_v62, 4  ;;  %v2033_v41 = vrot.slane %v2006_v21, 4 }
 0x293   : > { %v1309_v38 = vperm.slane %v1301_v7, %v2616_v5  ;;  %1411 = vrot.lane.b32.xlu2 %v1347_v51, %s2516_s8  ;;  %v3532_v24 = vsel %vm222_vm0, %v1390_v54, %v1365_v11  ;;  %v1819_v39 = vrot.slane %v1792_v47, 4  ;;  %1842 = vrot.lane.b32.xlu1 %v1760_v8, %s2513_s5  ;;  %v1621_v45 = vrot.slane %v3512_v48, 4 }
 0x294   : > { %v1543_v57 = vrot.slane %v3379_v30, 4  ;;  %v1334_v61 = vrot.slane %v3479_v29, 4  ;;  %v1379_v2 = vsel %vm222_vm0, %v1378_v19, %v1361_v14  ;;  %v1392_v62 = vrot.slane %v1365_v11, 4 }
 0x295   : > { %v1974_v21 = vperm.slane %v1966_v13, %v2649_v25  ;;  %v2022_v4 = vsel %vm222_vm0, %v3393_v56, %v2021_v55  ;;  %v3549_v54 = vsel %vm222_vm0, %v3402_v49, %v1763_v9  ;;  %v3553_v30 = vsel %vm222_vm0, %v3398_v17, %v2033_v41 }
 0x296   : > { %v1544_v37 = vsel %vm222_vm0, %v3341_v36, %v1543_v57  ;;  %v3545_v47 = vsel %vm222_vm0, %v1334_v61, %v1309_v38  ;;  %v1622_v11 = vsel %vm222_vm0, 0.0, %v1621_v45  ;;  %v3557_v12 = vperm.slane %v1379_v2, %v2649_v25 }
 0x297   : > { %v3561_v36 = vsel %vm222_vm0, %v3408_v58, %v1819_v39  ;;  %v1336_v56 = vrot.slane %v1309_v38, 4  ;;  %v3566_v49 = vperm.slane %v3420_v22, %v2649_v25  ;;  %v1599_v13 = vrot.slane %v3353_v1, 4 }
 0x298   : > { %v2030_v17 = vperm.slane %v2022_v4, %v2649_v25  ;;  %v3572_v7 = vsel %vm222_vm0, %v3458_v3, %v1392_v62  ;;  %v1402_v20 = vrot.slane %v3557_v12, 4  ;;  %v1989_v44 = vrot.slane %v1974_v21, 4 }
 0x299   : > { %2056 = vrot.lane.b32.xlu0 %v1974_v21, %s2513_s5  ;;  %v1600_v58 = vsel %vm222_vm0, %v3329_v16, %v1599_v13  ;;  %v1565_v22 = vrot.slane %v3566_v49, 4  ;;  %v3582_v1 = vsel %vm222_vm0, %v3479_v29, %v1336_v56  ;;  %v1380_v19 = vrot.slane %v1361_v14, 4 }
 0x29a   : > { %v1403_v43 = vsel %vm222_vm0, 0.0, %v1402_v20  ;;  %v1990_v16 = vsel %vm222_vm0, 0.0, %v1989_v44  ;;  %v1775_v9 = vrot.slane %v1760_v8, 4  ;;  %v1831_v29 = vrot.slane %v3449_v33, 4 }
 0x29b   : > { %1658 = vrot.lane.b32.xlu2 %v1622_v11, %s2516_s8  ;;  %2084 = vrot.lane.b32.xlu1 %v2030_v17, %s2513_s5  ;;  %v1566_v3 = vsel %vm222_vm0, 0.0, %v1565_v22  ;;  %v1381_v51 = vsel %vm222_vm0, %v3493_v32, %v1380_v19  ;;  %v1324_v14 = vrot.slane %v3472_v28, 4  ;;  %v2045_v8 = vrot.slane %v2030_v17, 4 }
 0x29c   : > { %v1776_v55 = vsel %vm222_vm0, 0.0, %v1775_v9  ;;  %v1389_v41 = vperm.slane %v1381_v51, %v2649_v25  ;;  %v1832_v38 = vsel %vm222_vm0, 0.0, %v1831_v29  ;;  %v1768_v39 = vperm.slane %v1762_v59, %v2649_v25 }
 0x29d   : > { %v1325_v32 = vsel %vm222_vm0, %v3411_v6, %v1324_v14  ;;  %v2046_v33 = vsel %vm222_vm0, 0.0, %v2045_v8  ;;  %v1552_v28 = vperm.slane %v1544_v37, %v2649_v25  ;;  %v1608_v57 = vperm.slane %v1600_v58, %v2649_v25 }
 0x29e   : > { %v1333_v45 = vperm.slane %v1325_v32, %v2649_v25  ;;  %v2038_v6 = vperm.slane %v3520_v46, %v2649_v25  ;;  %v1404_v59 = vrot.slane %v1389_v41, 4  ;;  %v1824_v61 = vperm.slane %v3523_v0, %v2649_v25 }
 0x29f   : > { %v1519_v2 = vrot.slane %v3268_v52, 4  ;;  %v3620_v62 = vperm.slane %v3215_v42, %v2649_v25  ;;  %v1982_v21 = vperm.slane %v3372_v18, %v2649_v25  ;;  %v3633_v42 = vperm.slane %v3182_v31, %v2616_v5 }
 0x2a0   : > { %v1405_v46 = vsel %vm222_vm0, 0.0, %v1404_v59  ;;  %v1575_v0 = vrot.slane %v3273_v27, 4  ;;  %v1777_v18 = vrot.slane %v1768_v39, 4  ;;  %v1348_v56 = vrot.slane %v1333_v45, 4 }
 0x2a1   : > { %1439 = vrot.lane.b32.xlu0 %v1403_v43, %s2516_s8  ;;  %v1194_v37 = vrot.slane %v3620_v62, 4  ;;  %v1520_v52 = vsel %vm222_vm0, %v3247_v53, %v1519_v2  ;;  %v1553_v11 = vrot.slane %v3633_v42, 4  ;;  %v3645_v31 = vperm.slane %v3202_v10, %v2616_v5 }
 0x2a2   : > { %v1528_v4 = vperm.slane %v1520_v52, %v2616_v5  ;;  %v1576_v53 = vsel %vm222_vm0, %v3241_v60, %v1575_v0  ;;  %v1778_v27 = vsel %vm222_vm0, 0.0, %v1777_v18  ;;  %v1567_v58 = vrot.slane %v1552_v28, 4 }
 0x2a3   : > { %2060 = vrot.lane.b32.xlu2 %v1990_v16, %s2515_s7  ;;  %1630 = vrot.lane.b32.xlu1 %v1566_v3, %s2516_s8  ;;  %v1195_v13 = vsel %vm222_vm0, 0.0, %v1194_v37  ;;  %v1584_v20 = vperm.slane %v1576_v53, %v2616_v5  ;;  %v1349_v22 = vsel %vm222_vm0, 0.0, %v1348_v56  ;;  %v1609_v44 = vrot.slane %v3645_v31, 4 }
 0x2a4   : > { %v1554_v17 = vsel %vm222_vm0, %v1553_v11, %v1528_v4  ;;  %v1623_v43 = vrot.slane %v1608_v57, 4  ;;  %v1568_v3 = vsel %vm222_vm0, 0.0, %v1567_v58  ;;  %v2047_v10 = vrot.slane %v2038_v6, 4 }
 0x2a5   : > { %v1610_v60 = vsel %vm222_vm0, %v1609_v44, %v1584_v20  ;;  %v1833_v16 = vrot.slane %v1824_v61, 4  ;;  %v1991_v9 = vrot.slane %v1982_v21, 4  ;;  %v1397_v29 = vperm.slane %v3532_v24, %v2649_v25 }
 0x2a6   : > { %v1624_v19 = vsel %vm222_vm0, 0.0, %v1623_v43  ;;  %v2048_v5 = vsel %vm222_vm0, 0.0, %v2047_v10  ;;  %v1181_v14 = vperm.slane %v3207_v26, %v2649_v25  ;;  %v1341_v8 = vperm.slane %v3545_v47, %v2649_v25 }
 0x2a7   : > { %v1834_v51 = vsel %vm222_vm0, 0.0, %v1833_v16  ;;  %v1560_v32 = vperm.slane %v1554_v17, %v2649_v25  ;;  %v2042_v26 = vperm.slane %v3553_v30, %v2649_v25  ;;  %v1406_v47 = vrot.slane %v1397_v29, 4 }
 0x2a8   : > { %v1196_v30 = vrot.slane %v1181_v14, 4  ;;  %v1611_v2 = vrot.slane %v1584_v20, 4 }
 0x2a9   : > { %1846 = vrot.lane.b32.xlu0 %v1776_v55, %s2515_s7  ;;  %v1992_v55 = vsel %vm222_vm0, 0.0, %v1991_v9  ;;  %v2049_v56 = vrot.slane %v2042_v26, 4 }
 0x2aa   : > { %v1612_v0 = vsel %vm222_vm0, %v3645_v31, %v1611_v2 }
 0x2ab   : > { %1443 = vrot.lane.b32.xlu2 %v1389_v41, %s2513_s5  ;;  %1874 = vrot.lane.b32.xlu1 %v1832_v38, %s2515_s7  ;;  %v1772_v38 = vperm.slane %v3549_v54, %v2649_v25 }
 0x2ad   : > { %v1779_v59 = vrot.slane %v1772_v38, 4 }
 0x2b1   : > { %2088 = vrot.lane.b32.xlu0 %v2046_v33, %s2515_s7  ;;  %v1616_v33 = vperm.slane %v1610_v60, %v2649_v25 }
 0x2b3   : > { %1850 = vrot.lane.b32.xlu2 %v1768_v39, %s2512_s4  ;;  %1415 = vrot.lane.b32.xlu1 %v1333_v45, %s2513_s5  ;;  %v1828_v39 = vperm.slane %v3561_v36, %v2649_v25  ;;  %v1986_v45 = vperm.slane %v3375_v15, %v2649_v25  ;;  %v1780_v15 = vsel %vm222_vm0, 0.0, %v1779_v59 }
 0x2b5   : > { %v1835_v31 = vrot.slane %v1828_v39, 4  ;;  %v1993_v43 = vrot.slane %v1986_v45, 4 }
 0x2b7   : > { %v1836_v60 = vsel %vm222_vm0, 0.0, %v1835_v31 }
 0x2b9   : > { %1634 = vrot.lane.b32.xlu0 %v1552_v28, %s2513_s5  ;;  %v1407_v28 = vsel %vm222_vm0, 0.0, %v1406_v47  ;;  %v1620_v47 = vperm.slane %v1612_v0, %v2649_v25 }
 0x2bb   : > { %2092 = vrot.lane.b32.xlu2 %v2038_v6, %s2512_s4  ;;  %1662 = vrot.lane.b32.xlu1 %v1608_v57, %s2513_s5  ;;  %v1555_v57 = vrot.slane %v1528_v4, 4 }
 0x2bd   : > { %v1556_v36 = vsel %vm222_vm0, %v3633_v42, %v1555_v57  ;;  %v1625_v42 = vrot.slane %v1616_v33, 4 }
 0x2bf   : > { %v1626_v53 = vsel %vm222_vm0, 0.0, %v1625_v42 }
 0x2c1   : > { %1878 = vrot.lane.b32.xlu0 %v1824_v61, %s2512_s4  ;;  %v1350_v61 = vrot.slane %v1341_v8, 4 }
 0x2c3   : > { %1447 = vrot.lane.b32.xlu2 %v1405_v46, %s2515_s7  ;;  %2064 = vrot.lane.b32.xlu1 %v1982_v21, %s2512_s4  ;;  %v1197_v21 = vsel %vm222_vm0, 0.0, %v1196_v30  ;;  %v1569_v46 = vrot.slane %v1560_v32, 4  ;;  %v1351_v52 = vsel %vm222_vm0, 0.0, %v1350_v61 }
 0x2c5   : > { %v1570_v11 = vsel %vm222_vm0, 0.0, %v1569_v46 }
 0x2c9   : > { %1231 = vrot.lane.b32.xlu0 %v1195_v13, %s2516_s8  ;;  %s2208_s8 = scalar_lea.sflag [#allocation4], %s186_s23 }
 0x2cb   : > { %1854 = vrot.lane.b32.xlu2 %v1778_v27, %s2518_s10  ;;  %1419 = vrot.lane.b32.xlu1 %v1349_v22, %s2515_s7  ;;  %v2050_v27 = vsel %vm222_vm0, 0.0, %v2049_v56 }
 0x2d1   : > { %1638 = vrot.lane.b32.xlu0 %v1568_v3, %s2515_s7  ;;  %v1401_v3 = vperm.slane %v3572_v7, %v2649_v25 }
 0x2d3   : > { %2096 = vrot.lane.b32.xlu2 %v2048_v5, %s2518_s10  ;;  %1666 = vrot.lane.b32.xlu1 %v1624_v19, %s2515_s7  ;;  %v1994_v5 = vsel %vm222_vm0, 0.0, %v1993_v43 }
 0x2d7   : > { %v2053_v41 = vpop.permute.xlu2 %2052 }
 0x2d8   : > { %v2107_v10 = vsel %vm390_vm1, %v3364_v34, %v2053_v41 }
 0x2d9   : > { %1882 = vrot.lane.b32.xlu0 %v1834_v51, %s2518_s10 }
 0x2db   : > { %1451 = vrot.lane.b32.xlu2 %v1397_v29, %s2512_s4  ;;  %2068 = vrot.lane.b32.xlu1 %v1992_v55, %s2518_s10  ;;  %v1142_v29 = vrot.slane %v3223_v40, 4  ;;  %v3904_v55 = vld [vmem:[#allocation8_spill] sm:$0xff] }
 0x2dc   : > { %v1189_v41 = vperm.slane %v3904_v55, %v2649_v25 }
 0x2e1   : > { %1235 = vrot.lane.b32.xlu0 %v1181_v14, %s2513_s5  ;;  %v1345_v14 = vperm.slane %v3582_v1, %v2649_v25  ;;  %s188_s5 = scalar_lea.vmem [#allocation3], %s2341_s27 }
 0x2e3   : > { %1858 = vrot.lane.b32.xlu2 %v1772_v38, %s2514_s6  ;;  %1423 = vrot.lane.b32.xlu1 %v1341_v8, %s2512_s4  ;;  %v1143_v38 = vsel %vm222_vm0, 0.0, %v1142_v29 }
 0x2e4   : > { %v1871_v24 = vpop.permute.xlu2 %1870 }
 0x2e9   : > { %1642 = vrot.lane.b32.xlu0 %v1560_v32, %s2512_s4 }
 0x2eb   : > { %2100 = vrot.lane.b32.xlu2 %v2042_v26, %s2514_s6  ;;  %1670 = vrot.lane.b32.xlu1 %v1616_v33, %s2512_s4  ;;  %v1408_v26 = vrot.slane %v1401_v3, 4 }
 0x2ed   : > { %v3683_v54 = vpop.permute.xlu2 %1411  ;;  %v1409_v1 = vsel %vm222_vm0, 0.0, %v1408_v26 }
 0x2f1   : > { %1886 = vrot.lane.b32.xlu0 %v1828_v39, %s2514_s6 }
 0x2f3   : > { %1455 = vrot.lane.b32.xlu2 %v1407_v28, %s2518_s10  ;;  %2072 = vrot.lane.b32.xlu1 %v1986_v45, %s2514_s6  ;;  %v1198_v45 = vrot.slane %v1189_v41, 4 }
 0x2f5   : > { %v3693_v6 = vpop.permute.xlu2 %1658  ;;  %v1199_v2 = vsel %vm222_vm0, 0.0, %v1198_v45 }
 0x2f9   : > { %1239 = vrot.lane.b32.xlu0 %v1197_v21, %s2515_s7  ;;  %v3905_v21 = vld [vmem:[#allocation6_spill] sm:$0xff] }
 0x2fa   : > { %v1839_v37 = vpop.permute.xlu0 %1838 }
 0x2fb   : > { %1862 = vrot.lane.b32.xlu2 %v1780_v15, %s2517_s9  ;;  %1427 = vrot.lane.b32.xlu1 %v1351_v52, %s2518_s10  ;;  %v1893_v22 = vsel %vm390_vm1, %v3433_v50, %v1839_v37  ;;  %v1137_v15 = vperm.slane %v3905_v21, %v2649_v25  ;;  %v3906_v37 = vld [vmem:[#allocation7_spill] sm:$0xff] }
 0x2fc   : > { %v1193_v52 = vperm.slane %v3906_v37, %v2649_v25 }
 0x2fd   : > { %v2061_v4 = vpop.permute.xlu2 %2060  ;;  %v1867_v18 = vpop.permute.xlu1 %1866 }
 0x2fe   : > { %v1900_v13 = vsel %vm390_vm1, %v3440_v35, %v1867_v18 }
 0x2ff   : > { %v1901_v17 = vsel %vm392_vm2, %v1900_v13, %v1871_v24  ;;  %v1564_v24 = vperm.slane %v1556_v36, %v2649_v25  ;;  %v1352_v36 = vrot.slane %v1345_v14, 4  ;;  %v1466_v13 = vsel %vm390_vm1, %v3498_v23, %v3683_v54 }
 0x301   : > { %1646 = vrot.lane.b32.xlu0 %v1570_v11, %s2518_s10  ;;  %v1571_v46 = vrot.slane %v1564_v24, 4  ;;  %v1627_v11 = vrot.slane %v1620_v47, 4 }
 0x303   : > { %v2081_v58 = vpop.permute.xlu0 %2080  ;;  %2104 = vrot.lane.b32.xlu2 %v2050_v27, %s2517_s9  ;;  %1674 = vrot.lane.b32.xlu1 %v1626_v53, %s2518_s10  ;;  %v1572_v25 = vsel %vm222_vm0, 0.0, %v1571_v46  ;;  %v1200_v53 = vrot.slane %v1193_v52, 4 }
 0x304   : > { %v2114_v51 = vsel %vm390_vm1, %v3485_v63, %v2081_v58  ;;  %v1628_v58 = vsel %vm222_vm0, 0.0, %v1627_v11 }
 0x305   : > { %v1444_v20 = vpop.permute.xlu2 %1443  ;;  %v1843_v44 = vpop.permute.xlu1 %1842  ;;  %v1201_v31 = vsel %vm222_vm0, 0.0, %v1200_v53 }
 0x306   : > { %v1894_v35 = vsel %vm392_vm2, %v1893_v22, %v1843_v44  ;;  %v1692_v44 = vsel %vm390_vm1, %v3512_v48, %v3693_v6 }
 0x309   : > { %1890 = vrot.lane.b32.xlu0 %v1836_v60, %s2517_s9  ;;  %v1144_v60 = vrot.slane %v1137_v15, 4 }
 0x30b   : > { %v2057_v19 = vpop.permute.xlu0 %2056  ;;  %1459 = vrot.lane.b32.xlu2 %v1401_v3, %s2514_s6  ;;  %2076 = vrot.lane.b32.xlu1 %v1994_v5, %s2517_s9 }
 0x30c   : > { %v2108_v50 = vsel %vm392_vm2, %v2107_v10, %v2057_v19 }
 0x30d   : > { %v1851_v16 = vpop.permute.xlu2 %1850  ;;  %v3728_v9 = vsel %vm394_vm3, %v2108_v50, %v2061_v4  ;;  %v2085_v7 = vpop.permute.xlu1 %2084  ;;  %v1353_v4 = vsel %vm222_vm0, 0.0, %v1352_v36 }
 0x30e   : > { %v2115_v34 = vsel %vm392_vm2, %v2114_v51, %v2085_v7 }
 0x311   : > { %1243 = vrot.lane.b32.xlu0 %v1189_v41, %s2512_s4  ;;  %s2225_s4 = scalar_lea.hbm %s3895_s2, %s2353_s28 }
 0x312   : > { %s2229_s7 = sshll.u32 %s2225_s4, 4  ;;  %s2230_s7 = int_to_ptr.hbm [resolvable:$true] %s2229_s7 }
 0x313   : > { %v1440_v8 = vpop.permute.xlu0 %1439  ;;  %1219 = vrot.lane.b32.xlu2 %v1143_v38, %s2518_s10  ;;  %1431 = vrot.lane.b32.xlu1 %v1345_v14, %s2514_s6 }
 0x314   : > { %v1473_v63 = vsel %vm390_vm1, %v3557_v12, %v1440_v8 }
 0x315   : > { %v2093_v40 = vpop.permute.xlu2 %2092  ;;  %v1474_v32 = vsel %vm392_vm2, %v1473_v63, %v1444_v20  ;;  %v1631_v33 = vpop.permute.xlu1 %1630 }
 0x316   : > { %v1685_v20 = vsel %vm390_vm1, %v3566_v49, %v1631_v33  ;;  %v1145_v49 = vsel %vm222_vm0, 0.0, %v1144_v60 }
 0x319   : > { %1650 = vrot.lane.b32.xlu0 %v1564_v24, %s2514_s6 }
 0x31b   : > { %v1847_v39 = vpop.permute.xlu0 %1846  ;;  %1463 = vrot.lane.b32.xlu2 %v1409_v1, %s2517_s9  ;;  %1678 = vrot.lane.b32.xlu1 %v1620_v47, %s2514_s6 }
 0x31c   : > { %v1895_v12 = vsel %vm394_vm3, %v1894_v35, %v1847_v39 }
 0x31d   : > { %v1448_v28 = vpop.permute.xlu2 %1447  ;;  %v1896_v57 = vsel %vm396_vm4, %v1895_v12, %v1851_v16  ;;  %v1875_v30 = vpop.permute.xlu1 %1874 }
 0x31e   : > { %v3754_v59 = vsel %vm394_vm3, %v1474_v32, %v1448_v28  ;;  %v1902_v61 = vsel %vm394_vm3, %v1901_v17, %v1875_v30 }
 0x321   : > { %1247 = vrot.lane.b32.xlu0 %v1199_v2, %s2518_s10 }
 0x323   : > { %v2089_v0 = vpop.permute.xlu0 %2088  ;;  %1223 = vrot.lane.b32.xlu2 %v1137_v15, %s2514_s6  ;;  %1435 = vrot.lane.b32.xlu1 %v1353_v4, %s2517_s9 }
 0x324   : > { %v2116_v42 = vsel %vm394_vm3, %v2115_v34, %v2089_v0 }
 0x325   : > { %v1855_v18 = vpop.permute.xlu2 %1854  ;;  %v2117_v56 = vsel %vm396_vm4, %v2116_v42, %v2093_v40  ;;  %v1416_v17 = vpop.permute.xlu1 %1415 }
 0x326   : > { %v1467_v27 = vsel %vm392_vm2, %v1466_v13, %v1416_v17  ;;  %v1897_v40 = vsel %vm398_vm5, %v1896_v57, %v1855_v18 }
 0x329   : > { %1654 = vrot.lane.b32.xlu0 %v1572_v25, %s2517_s9 }
 0x32b   : > { %v1635_v22 = vpop.permute.xlu0 %1634  ;;  %1255 = vrot.lane.b32.xlu2 %v1201_v31, %s2517_s9  ;;  %1682 = vrot.lane.b32.xlu1 %v1628_v58, %s2517_s9 }
 0x32c   : > { %v1686_v23 = vsel %vm392_vm2, %v1685_v20, %v1635_v22 }
 0x32d   : > { %v2097_v54 = vpop.permute.xlu2 %2096  ;;  %v1663_v35 = vpop.permute.xlu1 %1662 }
 0x32e   : > { %v1693_v43 = vsel %vm392_vm2, %v1692_v44, %v1663_v35  ;;  %v2118_v12 = vsel %vm398_vm5, %v2117_v56, %v2097_v54 }
 0x331   : > { %1251 = vrot.lane.b32.xlu0 %v1193_v52, %s2514_s6  ;;  %s2227_s6 = sshll.u32 %s188_s5, 4  ;;  %s2228_s6 = int_to_ptr.vmem [resolvable:$true] %s2227_s6 }
 0x333   : > { %v1879_v3 = vpop.permute.xlu0 %1878  ;;  %1227 = vrot.lane.b32.xlu1 %v1145_v49, %s2517_s9  ;;  %s2444_s9 = sshra.s32 %s2230_s7, 4  ;;  %s2445_s9 = int_to_ptr.hbm [resolvable:$true] %s2444_s9 }
 0x334   : > { %v1903_v10 = vsel %vm396_vm4, %v1902_v61, %v1879_v3  ;;  %s2446_s15 = scalar_lea.hbm %s2445_s9, 16  ;;  %p2451_p1 = scmp.lt.s32.totalorder %s2445_s9, %s3895_s2 }
 0x335   : > { %v1452_v19 = vpop.permute.xlu2 %1451  ;;  %v2065_v5 = vpop.permute.xlu1 %2064  ;;  %p2447_p12 = scmp.ne.s32.totalorder %s2445_s9, %s2446_s15  ;;  %p2452_p2 = scmp.lt.s32.totalorder %s2450_s18, %s2446_s15 }
 0x336   : > { %v2110_v50 = vsel %vm396_vm4, %v3728_v9, %v2065_v5  ;;  %v1476_v37 = vsel %vm396_vm4, %v3754_v59, %v1452_v19 }
 0x337   : > { %p2448_p13 = pnand %p2447_p12, %p2582_p4  ;;  %p2453_p3 = por %p2452_p2, %p2451_p1 }
 0x339   : > { %p2449_p0 = pneg %p2448_p13 }
 0x33b   : > { %v1232_v16 = vpop.permute.xlu0 %1231  ;;  %p2454_p5 = pnand %p2453_p3, %p2449_p0 }
 0x33c   : > { %v1265_v9 = vsel %vm390_vm1, %v3620_v62, %v1232_v16 }
 0x33d   : > { %v1859_v48 = vpop.permute.xlu2 %1858  ;;  %v1420_v6 = vpop.permute.xlu1 %1419 }
 0x33e   : > { %v3792_v51 = vsel %vm394_vm3, %v1467_v27, %v1420_v6  ;;  %v1898_v32 = vsel %vm400_vm6, %v1897_v40, %v1859_v48 }
 0x343   : > { %v1639_v7 = vpop.permute.xlu0 %1638 }
 0x344   : > { %v3795_v29 = vsel %vm394_vm3, %v1686_v23, %v1639_v7 }
 0x345   : > { %v2101_v34 = vpop.permute.xlu2 %2100  ;;  %v1667_v55 = vpop.permute.xlu1 %1666 }
 0x346   : > { %v3798_v41 = vsel %vm394_vm3, %v1693_v43, %v1667_v55  ;;  %v2119_v45 = vsel %vm400_vm6, %v2118_v12, %v2101_v34 }
 0x34b   : > { %v1883_v14 = vpop.permute.xlu0 %1882 }
 0x34c   : > { %v1904_v13 = vsel %vm398_vm5, %v1903_v10, %v1883_v14 }
 0x34d   : > { %v1456_v38 = vpop.permute.xlu2 %1455  ;;  %v2069_v8 = vpop.permute.xlu1 %2068 }
 0x34e   : > { %v1477_v0 = vsel %vm398_vm5, %v1476_v37, %v1456_v38  ;;  %v2111_v59 = vsel %vm398_vm5, %v2110_v50, %v2069_v8 }
 0x353   : > { %v1236_v63 = vpop.permute.xlu0 %1235 }
 0x354   : > { %v3804_v24 = vsel %vm392_vm2, %v1265_v9, %v1236_v63 }
 0x355   : > { %v1863_v33 = vpop.permute.xlu2 %1862  ;;  %v1424_v26 = vpop.permute.xlu1 %1423 }
 0x356   : > { %v1899_v47 = vsel %vm402_vm7, %v1898_v32, %v1863_v33  ;;  %v1469_v60 = vsel %vm396_vm4, %v3792_v51, %v1424_v26  ;;  %v3907_v26 = vld [vmem:[#allocation9_spill] sm:$0xff] }
 0x357   : > { %v1909_v1 = vrot.slane %v1899_v47, 4 }
 0x359   : > { %1913 = vst [vmem:[#allocation2 + $0x8] sm:$0xf0] %v1909_v1 }
 0x35b   : > { %v1643_v39 = vpop.permute.xlu0 %1642 }
 0x35c   : > { %v1688_v50 = vsel %vm396_vm4, %v3795_v29, %v1643_v39 }
 0x35d   : > { %v2105_v62 = vpop.permute.xlu2 %2104  ;;  %v1671_v28 = vpop.permute.xlu1 %1670 }
 0x35e   : > { %v2120_v57 = vsel %vm402_vm7, %v2119_v45, %v2105_v62  ;;  %v1695_v51 = vsel %vm396_vm4, %v3798_v41, %v1671_v28 }
 0x35f   : > { %2122 = vst [vmem:[#allocation2 + $0x38] sm:$0xf] %v2120_v57  ;;  %v2127_v57 = vld [vmem:[#allocation2 + $0x10] sm:$0xff] }
 0x363   : > { %v1887_v30 = vpop.permute.xlu0 %1886 }
 0x364   : > { %v1905_v17 = vsel %vm400_vm6, %v1904_v13, %v1887_v30  ;;  %v2123_v30 = vld [vmem:[%s3894_s1] sm:$0xff] }
 0x365   : > { %v1460_v61 = vpop.permute.xlu2 %1459  ;;  %v2073_v36 = vpop.permute.xlu1 %2072 }
 0x366   : > { %v2133_v2 = vld [vmem:[#allocation2 + $0x38] sm:$0xf]  ;;  %v1478_v4 = vsel %vm400_vm6, %v1477_v0, %v1460_v61  ;;  %v2112_v58 = vsel %vm400_vm6, %v2111_v59, %v2073_v36  ;;  %v2125_v36 = vld [vmem:[#allocation2] sm:$0xff] }
 0x367   : > { %2346 = vmatpush.msk.msra.mxu1 %vm2138_vm10, %v2133_v2  ;;  %v2126_v61 = vld [vmem:[#allocation2 + $0x18] sm:$0xff]  ;;  %v2124_v2 = vld [vmem:[#allocation2 + $0x30] sm:$0xff] }
 0x36b   : > { %v1240_v21 = vpop.permute.xlu0 %1239 }
 0x36c   : > { %v1267_v8 = vsel %vm394_vm3, %v3804_v24, %v1240_v21 }
 0x36d   : > { %v1220_v15 = vpop.permute.xlu2 %1219  ;;  %v1428_v46 = vpop.permute.xlu1 %1427 }
 0x36e   : > { %v1470_v3 = vsel %vm398_vm5, %v1469_v60, %v1428_v46  ;;  %v1262_v47 = vsel %vm398_vm5, %v3907_v26, %v1220_v15 }
 0x373   : > { %v1647_v52 = vpop.permute.xlu0 %1646 }
 0x374   : > { %v1689_v16 = vsel %vm398_vm5, %v1688_v50, %v1647_v52 }
 0x375   : > { %v1464_v42 = vpop.permute.xlu2 %1463  ;;  %v1675_v18 = vpop.permute.xlu1 %1674 }
 0x376   : > { %v1479_v11 = vsel %vm402_vm7, %v1478_v4, %v1464_v42  ;;  %v1696_v55 = vsel %vm398_vm5, %v1695_v51, %v1675_v18 }
 0x377   : > { %v1483_v56 = vrot.slane %v1479_v11, 4 }
 0x379   : > { %1487 = vst [vmem:[#allocation2 + $0x28] sm:$0xf0] %v1483_v56 }
 0x37b   : > { %v1891_v25 = vpop.permute.xlu0 %1890 }
 0x37c   : > { %v1906_v53 = vsel %vm402_vm7, %v1905_v17, %v1891_v25 }
 0x37d   : > { %v1910_v27 = vrot.slane %v1906_v53, 4  ;;  %v2077_v31 = vpop.permute.xlu1 %2076  ;;  %v1224_v48 = vpop.permute.xlu2 %1223 }
 0x37e   : > { %v2113_v20 = vsel %vm402_vm7, %v2112_v58, %v2077_v31  ;;  %v1263_v39 = vsel %vm400_vm6, %v1262_v47, %v1224_v48 }
 0x37f   : > { %1914 = vst [vmem:[#allocation2 + $0x20] sm:$0xf0] %v1910_v27 }
 0x380   : > { %2121 = vst [vmem:[#allocation2 + $0x40] sm:$0xf] %v2113_v20 }
 0x383   : > { %v1244_v22 = vpop.permute.xlu0 %1243 }
 0x384   : > { %v1268_v9 = vsel %vm396_vm4, %v1267_v8, %v1244_v22 }
 0x385   : > { %v1432_v23 = vpop.permute.xlu1 %1431  ;;  %v1256_v41 = vpop.permute.xlu2 %1255 }
 0x386   : > { %v1471_v49 = vsel %vm400_vm6, %v1470_v3, %v1432_v23 }
 0x387   : > { %v2132_v54 = vld [vmem:[#allocation2 + $0x40] sm:$0xf] }
 0x388   : > { %2344 = vmatpush.msk.msra.mxu0 %vm2138_vm10, %v2132_v54 }
 0x38b   : > { %v1651_v44 = vpop.permute.xlu0 %1650 }
 0x38c   : > { %v1690_v6 = vsel %vm400_vm6, %v1689_v16, %v1651_v44 }
 0x38d   : > { %v1679_v35 = vpop.permute.xlu1 %1678 }
 0x38e   : > { %v1697_v14 = vsel %vm400_vm6, %v1696_v55, %v1679_v35 }
 0x393   : > { %v1248_v43 = vpop.permute.xlu0 %1247 }
 0x394   : > { %v1269_v63 = vsel %vm398_vm5, %v1268_v9, %v1248_v43 }
 0x395   : > { %v1436_v10 = vpop.permute.xlu1 %1435 }
 0x396   : > { %v1472_v19 = vsel %vm402_vm7, %v1471_v49, %v1436_v10 }
 0x397   : > { %v1482_v5 = vrot.slane %v1472_v19, 4 }
 0x399   : > { %1486 = vst [vmem:[#allocation2 + $0x48] sm:$0xf0] %v1482_v5 }
 0x39b   : > { %v1655_v7 = vpop.permute.xlu0 %1654 }
 0x39c   : > { %v1691_v34 = vsel %vm402_vm7, %v1690_v6, %v1655_v7 }
 0x39d   : > { %1699 = vst [vmem:[#allocation2 + $0x8] sm:$0xf] %v1691_v34  ;;  %v1683_v38 = vpop.permute.xlu1 %1682 }
 0x39e   : > { %v1698_v29 = vsel %vm402_vm7, %v1697_v14, %v1683_v38 }
 0x39f   : > { %1700 = vst [vmem:[#allocation2 + $0x20] sm:$0xf] %v1698_v29 }
 0x3a3   : > { %v1252_v40 = vpop.permute.xlu0 %1251 }
 0x3a4   : > { %v1270_v32 = vsel %vm400_vm6, %v1269_v63, %v1252_v40  ;;  %v2130_v33 = vld [vmem:[#allocation2 + $0x8] sm:$0xff] }
 0x3a5   : > { %v1271_v1 = vsel %vm402_vm7, %v1270_v32, %v1256_v41  ;;  %2157 = vmatpush.msra.mxu0 %v2130_v33  ;;  %v1228_v12 = vpop.permute.xlu1 %1227 }
 0x3a6   : > { %1273 = vst [vmem:[#allocation2 + $0x28] sm:$0xf] %v1271_v1  ;;  %v1264_v24 = vsel %vm402_vm7, %v1263_v39, %v1228_v12  ;;  %v2131_v45 = vld [vmem:[#allocation2 + $0x20] sm:$0xff] }
 0x3a7   : > { %1272 = vst [vmem:[#allocation2 + $0x48] sm:$0xf] %v1264_v24  ;;  %2177 = vmatpush.msra.mxu1 %v2131_v45 }
 0x3ad   : > { %v2129_v62 = vld [vmem:[#allocation2 + $0x28] sm:$0xff] }
 0x3ae   : > { %2178 = vmatpush.msra.mxu1 %v2129_v62  ;;  %v2128_v28 = vld [vmem:[#allocation2 + $0x48] sm:$0xff] }
 0x3af   : > { %2158 = vmatpush.msra.mxu0 %v2128_v28 }
 0x3b0   : > { %2179 = vmatpush.msra.mxu1 %v2127_v57 }
 0x3b1   : > { %2159 = vmatpush.msra.mxu0 %v2126_v61 }
 0x3b2   : > { %2180 = vmatpush.msra.mxu1 %v2125_v36 }
 0x3b3   : > { %2347 = vmatmul.msk.f32.vlgmr.msra.gmra.mxu1 %vm2134_vm11, %v2123_v30  ;;  %2160 = vmatpush.msra.mxu0 %v2124_v2 }
 0x3b4   : > { %2345 = vmatmul.msk.f32.vlgmr.msra.gmra.mxu0 %vm2134_vm11, %v2123_v30 }
 0x430   : > { %v2182_v21 = vpop.f32.mrf.mxu1 }
 0x431   : > { %2186 = vst [vmem:[%s188_s5 + $0x8] sm:$0xff] %v2182_v21  ;;  %v2191_v15 = vmul.f32 %v2182_v21, %v2182_v21  ;;  %v2162_v46 = vpop.f32.mrf.mxu0 }
 0x432   : > { %2185 = vst [vmem:[%s188_s5] sm:$0xff] %v2162_v46  ;;  %v2190_v37 = vmul.f32 %v2162_v46, %v2162_v46  ;;  %v2187_v52 = vadd.f32 %v2182_v21, %v2162_v46 }
 0x433   : > { %2457 = shalt.err (!%p2454_p5)
}
 0x434   : > { %2355 = dma.vmem_to_hbm [thread:$0]  (%p2582_p4), %s2228_s6, 256, %s2230_s7, %s2208_s8   ;;  %v2192_v0 = vadd.f32 %v2191_v15, %v2190_v37  ;;  %2188 = vadd.xlane.f32.xlu0 %v2187_v52  ;;  %vm2199_vm12 = vcmask 15360   ;;  %v2521_v4 = vmov 0.0   ;;  %vm2202_vm13 = vcmask 7168  }
 0x435   : > { %s2343_s23 = sshll.u32 %s2599_s26, 3 }
 0x436   : > { %2193 = vadd.xlane.f32.xlu1 %v2192_v0  ;;  %s208_s29 = scalar_lea.vmem %s3896_s3, %s2343_s23 }
 0x437   : > { %2200 = vst.msk [vmem:[%s208_s29] sm:$0xff] %vm2199_vm12, %v2521_v4 }
 0x43e   : > { %v2201_v42 = vld [vmem:[%s208_s29] sm:$0xff] }
 0x4a7   : > { %v2189_v18 = vpop.xlane.xlu0 %2188 }
 0x4a9   : > { %v2194_v11 = vpop.xlane.xlu1 %2193 }
 0x4aa   : > { %v2203_v56 = vsel %vm2202_vm13, %v2189_v18, %v2194_v11 }
 0x4ab   : > { %v2204_v13 = vadd.f32 %v2203_v56, %v2201_v42 }
 0x4ad   : > { %2206 = vst.msk [vmem:[%s208_s29] sm:$0xff] %vm2199_vm12, %v2204_v13 }
 0x4ae PF: > { %p2361_p4 = scmp.ge.s32.totalorder %s2508_s17, 2  ;;  %s2244_s22 = sand.u32 1, %s2488_s12  }
 0x4af   : > { %s2245_s26 = scalar_lea.sflag [#allocation4], %s2244_s22 }
 0x4b0   : > { %p2358_p6 = pnand %p2361_p4, %p2589_p8 }
 0x4b2   : > { %p2359_p7 = pneg %p2358_p6 }
 0x4b4   : > { %2483 = dma.done.wait (%p2359_p7), %s2245_s26, 256  }
 0x4b5   : > { %2485 = vsyncadd (%p2359_p7), %s2245_s26, 4294967040  ;;  %s17_s17 = sadd.s32 1, %s2508_s17   ;;  %s3908_s12 = smov %s2492_s13 }
 0x4b6   : > { %p14_p9 = scmp.ge.s32.totalorder %s17_s17, 4   ;;  %s3909_s13 = smov %s2496_s14 }
 0x4b7   : > { %s3910_s14 = smov %s2595_s25  ;;  %s3911_s15 = smov %s2504_s16 }
 0x4b8   : > { %s3912_s16 = smov %s3914_s20  ;;  %16 = sbr.rel (!%p14_p9) target bundleno = 4 (0x4), region = 79 }
 0x4bd   :  { %2258 = vsyncpa [#allocation4], 1 }
 0x4be   :  { %2260 = vsyncpa [#allocation4 + $0x1], 1 }

</bundles_post_ra>
